<compile_context>
chip_gen: v6e
topology: v6e:2x2x1
jax: 0.10.0
libtpu: 0.0.40
codegen_flags: <defaults>
</compile_context>

<pallas_src>
import functools

import jax
import jax.numpy as jnp
from jax.experimental import pallas as pl
from jax.experimental.pallas import tpu as pltpu

KH = KW = 3        # kernel_size = 3, padding = 1, stride = 1
_MARGIN = 128      # lane-aligned zero margin on each side of the flattened image


def _one_conv_fused_kernel(x_ref, w0_ref, b0_ref, alpha_ref, w1_ref, b1_ref,
                           masks_ref, s_ref, out_ref, xbuf, ybuf, *, width):
    # x_ref    : (B_blk, Cin, H*W)  f32   flattened input images
    # w0_ref   : (3, G, 3*Cin)      bf16  conv  weights, kw-grouped, pre-transposed
    # b0_ref   : (G, 1)             f32   conv  bias
    # alpha_ref: (G, 1)             f32   PReLU per-channel slope
    # w1_ref   : (3, Cin, 3*G)      bf16  conv1 weights, kw-grouped, pre-transposed
    # b1_ref   : (Cin, 1)           f32   conv1 bias
    # masks_ref: (2, H*W)           bf16  row-wrap masks for taps dx=-1 / dx=+1
    # s_ref    : (2,) SMEM          f32   [s1, s2] Scale weights
    # out_ref  : (B_blk, Cin, H*W)  f32
    # xbuf     : (Cin, H*W + 2*_MARGIN) bf16 VMEM scratch (zero-margined input)
    # ybuf     : (G,   H*W + 2*_MARGIN) bf16 VMEM scratch (zero-margined activation)
    bb, cin, hw = x_ref.shape
    g = b0_ref.shape[0]
    pad = _MARGIN

    # Zero only the margin columns; the interior is fully overwritten below.
    # (Margins provide the 1-pixel vertical "SAME" zero padding for free.)
    xbuf[:, :pad] = jnp.zeros((cin, pad), xbuf.dtype)
    xbuf[:, pad + hw:] = jnp.zeros((cin, pad), xbuf.dtype)
    ybuf[:, :pad] = jnp.zeros((g, pad), ybuf.dtype)
    ybuf[:, pad + hw:] = jnp.zeros((g, pad), ybuf.dtype)

    mask_l = masks_ref[0:1]          # (1, hw) bf16, zero where col % W == 0
    mask_r = masks_ref[1:2]          # (1, hw) bf16, zero where col % W == W-1
    s1 = s_ref[0]
    s2 = s_ref[1]

    def conv3x3(buf, w_ref):
        # kw-grouped 3x3 conv: one (Cout, 3*Cin_tap) @ (3*Cin_tap, hw) MXU
        # matmul per horizontal tap offset, accumulated in f32.
        cout = w_ref.shape[1]
        acc = jnp.zeros((cout, hw), jnp.float32)
        for kw in range(KW):
            dx = kw - 1
            # Concatenate the three vertically shifted views (kh = 0,1,2) of
            # the margined buffer along the contraction axis.
            rhs = jnp.concatenate(
                [buf[:, pad + (kh - 1) * width + dx:
                        pad + (kh - 1) * width + dx + hw] for kh in range(KH)],
                axis=0)                                    # (3*C, hw) bf16
            if kw == 0:
                rhs = rhs * mask_l                         # mask once per group
            elif kw == KW - 1:
                rhs = rhs * mask_r
            acc = acc + jnp.dot(w_ref[kw], rhs,
                                preferred_element_type=jnp.float32)
        return acc

    # Static batch-block loop: amortizes per-grid-step pipeline overhead for
    # small images.  The scratch interiors are reused sequentially per image.
    for b in range(bb):
        x = x_ref[b]                                       # (Cin, hw) f32
        xbuf[:, pad:pad + hw] = x.astype(xbuf.dtype)

        # conv (Cin -> G) + bias + PReLU    (elementwise math kept in f32)
        z = conv3x3(xbuf, w0_ref) + b0_ref[...]
        y = jnp.where(z >= 0.0, z, alpha_ref[...] * z)
        ybuf[:, pad:pad + hw] = y.astype(ybuf.dtype)

        # conv1 (G -> Cin) + bias, then scaled residual (x reused, f32).
        z1 = conv3x3(ybuf, w1_ref) + b1_ref[...]
        out_ref[b] = (s1 * x + s2 * z1).astype(out_ref.dtype)


@jax.jit
def one_conv_forward(x_nchw, w0, b0, alpha, w1, b1, s1, s2):
    """Pallas implementation of one_conv.forward (relu=True path).

    x_nchw: (N, Cin, H, W) float32   (PyTorch layout, kept — only reshaped)
    w0: (KH, KW, Cin, G) HWIO, b0: (G,), alpha: (G,)  [pass alpha=1 for relu=False]
    w1: (KH, KW, G, Cin) HWIO, b1: (Cin,), s1/s2: scalar Scale weights
    returns: (N, Cin, H, W) float32
    """
    n, cin, h, w = x_nchw.shape
    g = w0.shape[-1]
    hw = h * w
    assert w + 1 <= _MARGIN, "image width must be <= _MARGIN - 1"

    x = x_nchw.reshape(n, cin, hw).astype(jnp.float32)

    # kw-grouped weight matrices, pre-transposed so the in-kernel matmul is
    # (Cout, 3*Cin_tap) @ (3*Cin_tap, H*W); contraction index = kh*Cin_tap + c.
    # Cast to bf16: matmul operands are stored in bf16, accumulation stays f32.
    w0_g = jnp.transpose(w0, (1, 3, 0, 2)).reshape(KW, g, KH * cin).astype(jnp.bfloat16)
    w1_g = jnp.transpose(w1, (1, 3, 0, 2)).reshape(KW, cin, KH * g).astype(jnp.bfloat16)
    b0_c = b0.reshape(g, 1).astype(jnp.float32)
    a_c = alpha.reshape(g, 1).astype(jnp.float32)
    b1_c = b1.reshape(cin, 1).astype(jnp.float32)
    s12 = jnp.stack([jnp.asarray(s1, jnp.float32), jnp.asarray(s2, jnp.float32)])

    # Row-wrap column masks for the horizontally shifted taps, precomputed
    # once here (loaded once into VMEM; block index is constant).
    col = jnp.arange(hw, dtype=jnp.int32) % w
    masks = jnp.stack([(col >= 1), (col <= w - 2)]).astype(jnp.bfloat16)  # (2, hw)

    # Batch blocking: several images per grid step for small images.
    bb = 1
    for cand in (4, 2, 1):
        if n % cand == 0:
            bb = cand
            break

    kernel = functools.partial(_one_conv_fused_kernel, width=w)
    out = pl.pallas_call(
        kernel,
        out_shape=jax.ShapeDtypeStruct((n, cin, hw), jnp.float32),
        grid=(n // bb,),
        in_specs=[
            pl.BlockSpec((bb, cin, hw), lambda i: (i, 0, 0)),           # x
            pl.BlockSpec((KW, g, KH * cin), lambda i: (0, 0, 0)),       # w0 (kw-grouped)
            pl.BlockSpec((g, 1), lambda i: (0, 0)),                     # b0
            pl.BlockSpec((g, 1), lambda i: (0, 0)),                     # alpha
            pl.BlockSpec((KW, cin, KH * g), lambda i: (0, 0, 0)),       # w1 (kw-grouped)
            pl.BlockSpec((cin, 1), lambda i: (0, 0)),                   # b1
            pl.BlockSpec((2, hw), lambda i: (0, 0)),                    # wrap masks
            pl.BlockSpec(memory_space=pltpu.MemorySpace.SMEM),          # [s1, s2]
        ],
        out_specs=pl.BlockSpec((bb, cin, hw), lambda i: (i, 0, 0)),
        scratch_shapes=[
            pltpu.VMEM((cin, hw + 2 * _MARGIN), jnp.bfloat16),
            pltpu.VMEM((g, hw + 2 * _MARGIN), jnp.bfloat16),
        ],
        compiler_params=pltpu.CompilerParams(
            dimension_semantics=("parallel",)),
    )(x, w0_g, b0_c, a_c, w1_g, b1_c, masks, s12)

    return out.reshape(n, cin, h, w)


def _reference(x_nchw, w0, b0, alpha, w1, b1, s1, s2):
    """Pure-JAX reference (lax conv) matching the PyTorch forward."""
    dn = ("NHWC", "HWIO", "NHWC")
    x = jnp.transpose(x_nchw, (0, 2, 3, 1))
    y = jax.lax.conv_general_dilated(x, w0, (1, 1), "SAME",
                                     dimension_numbers=dn) + b0.reshape(1, 1, 1, -1)
    y = jnp.where(y >= 0.0, y, alpha.reshape(1, 1, 1, -1) * y)   # PReLU
    z = jax.lax.conv_general_dilated(y, w1, (1, 1), "SAME",
                                     dimension_numbers=dn) + b1.reshape(1, 1, 1, -1)
    out = s1 * x + s2 * z
    return jnp.transpose(out, (0, 3, 1, 2))


if __name__ == "__main__":
    # Small shapes consistent with the module: inchanels=4, growth_rate=8.
    N, Cin, H, W = 2, 4, 16, 16
    G = 8

    key = jax.random.PRNGKey(0)
    k_x, k_w0, k_b0, k_w1, k_b1 = jax.random.split(key, 5)

    x = jax.random.normal(k_x, (N, Cin, H, W), jnp.float32)

    # Deterministic parameter init (shapes from __init__; values synthetic).
    w0 = jax.random.normal(k_w0, (KH, KW, Cin, G), jnp.float32) * 0.1   # conv  (HWIO)
    b0 = jax.random.normal(k_b0, (G,), jnp.float32) * 0.1
    alpha = jnp.full((G,), 0.25, jnp.float32)                           # PReLU default
    w1 = jax.random.normal(k_w1, (KH, KW, G, Cin), jnp.float32) * 0.1   # conv1 (HWIO)
    b1 = jax.random.normal(k_b1, (Cin,), jnp.float32) * 0.1
    s1 = jnp.float32(1.0)                                               # common.Scale(1)
    s2 = jnp.float32(1.0)                                               # common.Scale(1)
    # TODO(synk): original module defines a weight_norm lambda `wn` but never
    # applies it, so plain conv weights are used here (matches the PyTorch code).

    out = one_conv_forward(x, w0, b0, alpha, w1, b1, s1, s2)
    out = jax.block_until_ready(out)

    ref = _reference(x, w0, b0, alpha, w1, b1, s1, s2)
    assert out.shape == (N, Cin, H, W)
    # bf16 operand storage for the matmuls is an explicit choice (per review);
    # tolerance sized for bf16-accuracy convolutions with f32 accumulation.
    assert jnp.allclose(out, ref, atol=3e-2, rtol=3e-2), float(jnp.max(jnp.abs(out - ref)))

    print("KERNEL_OK")
</pallas_src>

<mosaic_0001>
module attributes {stable_mosaic.version = 11 : i64} {
  func.func @_one_conv_fused_kernel(%arg0: i32, %arg1: memref<2x4x256xf32, #tpu.memory_space<vmem>>, %arg2: memref<3x8x12xbf16, #tpu.memory_space<vmem>>, %arg3: memref<8x1xf32, #tpu.memory_space<vmem>>, %arg4: memref<8x1xf32, #tpu.memory_space<vmem>>, %arg5: memref<3x4x24xbf16, #tpu.memory_space<vmem>>, %arg6: memref<4x1xf32, #tpu.memory_space<vmem>>, %arg7: memref<2x256xbf16, #tpu.memory_space<vmem>>, %arg8: memref<2xf32, #tpu.memory_space<smem>>, %arg9: memref<2x4x256xf32, #tpu.memory_space<vmem>>, %arg10: memref<4x512xbf16, #tpu.memory_space<vmem>>, %arg11: memref<8x512xbf16, #tpu.memory_space<vmem>>) attributes {dimension_semantics = [#tpu.dimension_semantics<parallel>], iteration_bounds = array<i64: 1>, scalar_prefetch = 0 : i64, scratch_operands = 2 : i64, tpu.core_type = #tpu.core_type<tc>, window_params = [{transform_indices = @transform_0, window_bounds = array<i64: 2, 4, 256>}, {pipeline_mode = #tpu.pipeline_mode<synchronous>, transform_indices = @transform_1, window_bounds = array<i64: 3, 8, 12>}, {pipeline_mode = #tpu.pipeline_mode<synchronous>, transform_indices = @transform_2, window_bounds = array<i64: 8, 1>}, {pipeline_mode = #tpu.pipeline_mode<synchronous>, transform_indices = @transform_3, window_bounds = array<i64: 8, 1>}, {pipeline_mode = #tpu.pipeline_mode<synchronous>, transform_indices = @transform_4, window_bounds = array<i64: 3, 4, 24>}, {pipeline_mode = #tpu.pipeline_mode<synchronous>, transform_indices = @transform_5, window_bounds = array<i64: 4, 1>}, {pipeline_mode = #tpu.pipeline_mode<synchronous>, transform_indices = @transform_6, window_bounds = array<i64: 2, 256>}, {transform_indices = @transform_7, window_bounds = array<i64: 2>}, {transform_indices = @transform_8, window_bounds = array<i64: 2, 4, 256>}]} {
    %cst = arith.constant 0.000000e+00 : bf16
    %0 = vector.broadcast %cst : bf16 to vector<4x128xbf16>
    %c0 = arith.constant 0 : index
    %c0_0 = arith.constant 0 : index
    %1 = vector.load %arg10[%c0, %c0_0] : memref<4x512xbf16, #tpu.memory_space<vmem>>, vector<4x128xbf16>
    tpu.vector_store %arg10[%c0, %c0_0], %0 {strides = array<i32>} : memref<4x512xbf16, #tpu.memory_space<vmem>>, vector<4x128xbf16>,
    %cst_1 = arith.constant 0.000000e+00 : bf16
    %2 = vector.broadcast %cst_1 : bf16 to vector<4x128xbf16>
    %c0_2 = arith.constant 0 : index
    %c384 = arith.constant 384 : index
    %3 = vector.load %arg10[%c0_2, %c384] : memref<4x512xbf16, #tpu.memory_space<vmem>>, vector<4x128xbf16>
    tpu.vector_store %arg10[%c0_2, %c384], %2 {strides = array<i32>} : memref<4x512xbf16, #tpu.memory_space<vmem>>, vector<4x128xbf16>,
    %cst_3 = arith.constant 0.000000e+00 : bf16
    %4 = vector.broadcast %cst_3 : bf16 to vector<8x128xbf16>
    %c0_4 = arith.constant 0 : index
    %c0_5 = arith.constant 0 : index
    %5 = vector.load %arg11[%c0_4, %c0_5] : memref<8x512xbf16, #tpu.memory_space<vmem>>, vector<8x128xbf16>
    tpu.vector_store %arg11[%c0_4, %c0_5], %4 {strides = array<i32>} : memref<8x512xbf16, #tpu.memory_space<vmem>>, vector<8x128xbf16>,
    %cst_6 = arith.constant 0.000000e+00 : bf16
    %6 = vector.broadcast %cst_6 : bf16 to vector<8x128xbf16>
    %c0_7 = arith.constant 0 : index
    %c384_8 = arith.constant 384 : index
    %7 = vector.load %arg11[%c0_7, %c384_8] : memref<8x512xbf16, #tpu.memory_space<vmem>>, vector<8x128xbf16>
    tpu.vector_store %arg11[%c0_7, %c384_8], %6 {strides = array<i32>} : memref<8x512xbf16, #tpu.memory_space<vmem>>, vector<8x128xbf16>,
    %c0_9 = arith.constant 0 : index
    %c0_10 = arith.constant 0 : index
    %8 = vector.load %arg7[%c0_9, %c0_10] : memref<2x256xbf16, #tpu.memory_space<vmem>>, vector<1x256xbf16>
    %c1 = arith.constant 1 : index
    %c0_11 = arith.constant 0 : index
    %9 = vector.load %arg7[%c1, %c0_11] : memref<2x256xbf16, #tpu.memory_space<vmem>>, vector<1x256xbf16>
    %c0_12 = arith.constant 0 : index
    %10 = memref.load %arg8[%c0_12] : memref<2xf32, #tpu.memory_space<smem>>
    %c1_13 = arith.constant 1 : index
    %11 = memref.load %arg8[%c1_13] : memref<2xf32, #tpu.memory_space<smem>>
    %c0_14 = arith.constant 0 : index
    %c0_15 = arith.constant 0 : index
    %c0_16 = arith.constant 0 : index
    %12 = vector.load %arg1[%c0_14, %c0_15, %c0_16] : memref<2x4x256xf32, #tpu.memory_space<vmem>>, vector<1x4x256xf32>
    %13 = vector.shape_cast %12 : vector<1x4x256xf32> to vector<4x256xf32>
    %14 = arith.truncf %13 : vector<4x256xf32> to vector<4x256xbf16>
    %c0_17 = arith.constant 0 : index
    %c128 = arith.constant 128 : index
    %15 = vector.load %arg10[%c0_17, %c128] : memref<4x512xbf16, #tpu.memory_space<vmem>>, vector<4x256xbf16>
    tpu.vector_store %arg10[%c0_17, %c128], %14 {strides = array<i32>} : memref<4x512xbf16, #tpu.memory_space<vmem>>, vector<4x256xbf16>,
    %cst_18 = arith.constant 0.000000e+00 : f32
    %16 = vector.broadcast %cst_18 : f32 to vector<8x256xf32>
    %c0_19 = arith.constant 0 : index
    %c111 = arith.constant 111 : index
    %17 = vector.load %arg10[%c0_19, %c111] : memref<4x512xbf16, #tpu.memory_space<vmem>>, vector<4x256xbf16>
    %c0_20 = arith.constant 0 : index
    %c127 = arith.constant 127 : index
    %18 = vector.load %arg10[%c0_20, %c127] : memref<4x512xbf16, #tpu.memory_space<vmem>>, vector<4x256xbf16>
    %c0_21 = arith.constant 0 : index
    %c143 = arith.constant 143 : index
    %19 = vector.load %arg10[%c0_21, %c143] : memref<4x512xbf16, #tpu.memory_space<vmem>>, vector<4x256xbf16>
    %20 = tpu.concatenate %17, %18, %19 in 0 : vector<4x256xbf16>, vector<4x256xbf16>, vector<4x256xbf16> -> vector<12x256xbf16>
    %21 = vector.broadcast %8 : vector<1x256xbf16> to vector<12x256xbf16>
    %22 = arith.mulf %20, %21 : vector<12x256xbf16>
    %c0_22 = arith.constant 0 : index
    %c0_23 = arith.constant 0 : index
    %c0_24 = arith.constant 0 : index
    %23 = vector.load %arg2[%c0_22, %c0_23, %c0_24] : memref<3x8x12xbf16, #tpu.memory_space<vmem>>, vector<1x8x12xbf16>
    %24 = vector.shape_cast %23 : vector<1x8x12xbf16> to vector<8x12xbf16>
    %cst_25 = arith.constant dense<0.000000e+00> : vector<8x256xf32>
    %25 = tpu.matmul %24, %22, %cst_25 {dimension_numbers = #tpu.dot_dimension_numbers<[1], [0], [0], [1], [0, 0, 1, 1], [], []>} : vector<8x12xbf16>, vector<12x256xbf16>, vector<8x256xf32> -> vector<8x256xf32>
    %26 = arith.addf %16, %25 : vector<8x256xf32>
    %c0_26 = arith.constant 0 : index
    %c112 = arith.constant 112 : index
    %27 = vector.load %arg10[%c0_26, %c112] : memref<4x512xbf16, #tpu.memory_space<vmem>>, vector<4x256xbf16>
    %c0_27 = arith.constant 0 : index
    %c128_28 = arith.constant 128 : index
    %28 = vector.load %arg10[%c0_27, %c128_28] : memref<4x512xbf16, #tpu.memory_space<vmem>>, vector<4x256xbf16>
    %c0_29 = arith.constant 0 : index
    %c144 = arith.constant 144 : index
    %29 = vector.load %arg10[%c0_29, %c144] : memref<4x512xbf16, #tpu.memory_space<vmem>>, vector<4x256xbf16>
    %30 = tpu.concatenate %27, %28, %29 in 0 : vector<4x256xbf16>, vector<4x256xbf16>, vector<4x256xbf16> -> vector<12x256xbf16>
    %c1_30 = arith.constant 1 : index
    %c0_31 = arith.constant 0 : index
    %c0_32 = arith.constant 0 : index
    %31 = vector.load %arg2[%c1_30, %c0_31, %c0_32] : memref<3x8x12xbf16, #tpu.memory_space<vmem>>, vector<1x8x12xbf16>
    %32 = vector.shape_cast %31 : vector<1x8x12xbf16> to vector<8x12xbf16>
    %cst_33 = arith.constant dense<0.000000e+00> : vector<8x256xf32>
    %33 = tpu.matmul %32, %30, %cst_33 {dimension_numbers = #tpu.dot_dimension_numbers<[1], [0], [0], [1], [0, 0, 1, 1], [], []>} : vector<8x12xbf16>, vector<12x256xbf16>, vector<8x256xf32> -> vector<8x256xf32>
    %34 = arith.addf %26, %33 : vector<8x256xf32>
    %c0_34 = arith.constant 0 : index
    %c113 = arith.constant 113 : index
    %35 = vector.load %arg10[%c0_34, %c113] : memref<4x512xbf16, #tpu.memory_space<vmem>>, vector<4x256xbf16>
    %c0_35 = arith.constant 0 : index
    %c129 = arith.constant 129 : index
    %36 = vector.load %arg10[%c0_35, %c129] : memref<4x512xbf16, #tpu.memory_space<vmem>>, vector<4x256xbf16>
    %c0_36 = arith.constant 0 : index
    %c145 = arith.constant 145 : index
    %37 = vector.load %arg10[%c0_36, %c145] : memref<4x512xbf16, #tpu.memory_space<vmem>>, vector<4x256xbf16>
    %38 = tpu.concatenate %35, %36, %37 in 0 : vector<4x256xbf16>, vector<4x256xbf16>, vector<4x256xbf16> -> vector<12x256xbf16>
    %39 = vector.broadcast %9 : vector<1x256xbf16> to vector<12x256xbf16>
    %40 = arith.mulf %38, %39 : vector<12x256xbf16>
    %c2 = arith.constant 2 : index
    %c0_37 = arith.constant 0 : index
    %c0_38 = arith.constant 0 : index
    %41 = vector.load %arg2[%c2, %c0_37, %c0_38] : memref<3x8x12xbf16, #tpu.memory_space<vmem>>, vector<1x8x12xbf16>
    %42 = vector.shape_cast %41 : vector<1x8x12xbf16> to vector<8x12xbf16>
    %cst_39 = arith.constant dense<0.000000e+00> : vector<8x256xf32>
    %43 = tpu.matmul %42, %40, %cst_39 {dimension_numbers = #tpu.dot_dimension_numbers<[1], [0], [0], [1], [0, 0, 1, 1], [], []>} : vector<8x12xbf16>, vector<12x256xbf16>, vector<8x256xf32> -> vector<8x256xf32>
    %44 = arith.addf %34, %43 : vector<8x256xf32>
    %c0_40 = arith.constant 0 : index
    %c0_41 = arith.constant 0 : index
    %45 = vector.load %arg3[%c0_40, %c0_41] : memref<8x1xf32, #tpu.memory_space<vmem>>, vector<8x1xf32>
    %46 = vector.broadcast %45 : vector<8x1xf32> to vector<8x256xf32>
    %47 = arith.addf %44, %46 : vector<8x256xf32>
    %cst_42 = arith.constant 0.000000e+00 : f32
    %48 = vector.broadcast %cst_42 : f32 to vector<8x256xf32>
    %49 = arith.cmpf oge, %47, %48 : vector<8x256xf32>
    %c0_43 = arith.constant 0 : index
    %c0_44 = arith.constant 0 : index
    %50 = vector.load %arg4[%c0_43, %c0_44] : memref<8x1xf32, #tpu.memory_space<vmem>>, vector<8x1xf32>
    %51 = vector.broadcast %50 : vector<8x1xf32> to vector<8x256xf32>
    %52 = arith.mulf %51, %47 : vector<8x256xf32>
    %53 = arith.select %49, %47, %52 : vector<8x256xi1>, vector<8x256xf32>
    %54 = arith.truncf %53 : vector<8x256xf32> to vector<8x256xbf16>
    %c0_45 = arith.constant 0 : index
    %c128_46 = arith.constant 128 : index
    %55 = vector.load %arg11[%c0_45, %c128_46] : memref<8x512xbf16, #tpu.memory_space<vmem>>, vector<8x256xbf16>
    tpu.vector_store %arg11[%c0_45, %c128_46], %54 {strides = array<i32>} : memref<8x512xbf16, #tpu.memory_space<vmem>>, vector<8x256xbf16>,
    %cst_47 = arith.constant 0.000000e+00 : f32
    %56 = vector.broadcast %cst_47 : f32 to vector<4x256xf32>
    %c0_48 = arith.constant 0 : index
    %c111_49 = arith.constant 111 : index
    %57 = vector.load %arg11[%c0_48, %c111_49] : memref<8x512xbf16, #tpu.memory_space<vmem>>, vector<8x256xbf16>
    %c0_50 = arith.constant 0 : index
    %c127_51 = arith.constant 127 : index
    %58 = vector.load %arg11[%c0_50, %c127_51] : memref<8x512xbf16, #tpu.memory_space<vmem>>, vector<8x256xbf16>
    %c0_52 = arith.constant 0 : index
    %c143_53 = arith.constant 143 : index
    %59 = vector.load %arg11[%c0_52, %c143_53] : memref<8x512xbf16, #tpu.memory_space<vmem>>, vector<8x256xbf16>
    %60 = tpu.concatenate %57, %58, %59 in 0 : vector<8x256xbf16>, vector<8x256xbf16>, vector<8x256xbf16> -> vector<24x256xbf16>
    %61 = vector.broadcast %8 : vector<1x256xbf16> to vector<24x256xbf16>
    %62 = arith.mulf %60, %61 : vector<24x256xbf16>
    %c0_54 = arith.constant 0 : index
    %c0_55 = arith.constant 0 : index
    %c0_56 = arith.constant 0 : index
    %63 = vector.load %arg5[%c0_54, %c0_55, %c0_56] : memref<3x4x24xbf16, #tpu.memory_space<vmem>>, vector<1x4x24xbf16>
    %64 = vector.shape_cast %63 : vector<1x4x24xbf16> to vector<4x24xbf16>
    %cst_57 = arith.constant dense<0.000000e+00> : vector<4x256xf32>
    %65 = tpu.matmul %64, %62, %cst_57 {dimension_numbers = #tpu.dot_dimension_numbers<[1], [0], [0], [1], [0, 0, 1, 1], [], []>} : vector<4x24xbf16>, vector<24x256xbf16>, vector<4x256xf32> -> vector<4x256xf32>
    %66 = arith.addf %56, %65 : vector<4x256xf32>
    %c0_58 = arith.constant 0 : index
    %c112_59 = arith.constant 112 : index
    %67 = vector.load %arg11[%c0_58, %c112_59] : memref<8x512xbf16, #tpu.memory_space<vmem>>, vector<8x256xbf16>
    %c0_60 = arith.constant 0 : index
    %c128_61 = arith.constant 128 : index
    %68 = vector.load %arg11[%c0_60, %c128_61] : memref<8x512xbf16, #tpu.memory_space<vmem>>, vector<8x256xbf16>
    %c0_62 = arith.constant 0 : index
    %c144_63 = arith.constant 144 : index
    %69 = vector.load %arg11[%c0_62, %c144_63] : memref<8x512xbf16, #tpu.memory_space<vmem>>, vector<8x256xbf16>
    %70 = tpu.concatenate %67, %68, %69 in 0 : vector<8x256xbf16>, vector<8x256xbf16>, vector<8x256xbf16> -> vector<24x256xbf16>
    %c1_64 = arith.constant 1 : index
    %c0_65 = arith.constant 0 : index
    %c0_66 = arith.constant 0 : index
    %71 = vector.load %arg5[%c1_64, %c0_65, %c0_66] : memref<3x4x24xbf16, #tpu.memory_space<vmem>>, vector<1x4x24xbf16>
    %72 = vector.shape_cast %71 : vector<1x4x24xbf16> to vector<4x24xbf16>
    %cst_67 = arith.constant dense<0.000000e+00> : vector<4x256xf32>
    %73 = tpu.matmul %72, %70, %cst_67 {dimension_numbers = #tpu.dot_dimension_numbers<[1], [0], [0], [1], [0, 0, 1, 1], [], []>} : vector<4x24xbf16>, vector<24x256xbf16>, vector<4x256xf32> -> vector<4x256xf32>
    %74 = arith.addf %66, %73 : vector<4x256xf32>
    %c0_68 = arith.constant 0 : index
    %c113_69 = arith.constant 113 : index
    %75 = vector.load %arg11[%c0_68, %c113_69] : memref<8x512xbf16, #tpu.memory_space<vmem>>, vector<8x256xbf16>
    %c0_70 = arith.constant 0 : index
    %c129_71 = arith.constant 129 : index
    %76 = vector.load %arg11[%c0_70, %c129_71] : memref<8x512xbf16, #tpu.memory_space<vmem>>, vector<8x256xbf16>
    %c0_72 = arith.constant 0 : index
    %c145_73 = arith.constant 145 : index
    %77 = vector.load %arg11[%c0_72, %c145_73] : memref<8x512xbf16, #tpu.memory_space<vmem>>, vector<8x256xbf16>
    %78 = tpu.concatenate %75, %76, %77 in 0 : vector<8x256xbf16>, vector<8x256xbf16>, vector<8x256xbf16> -> vector<24x256xbf16>
    %79 = vector.broadcast %9 : vector<1x256xbf16> to vector<24x256xbf16>
    %80 = arith.mulf %78, %79 : vector<24x256xbf16>
    %c2_74 = arith.constant 2 : index
    %c0_75 = arith.constant 0 : index
    %c0_76 = arith.constant 0 : index
    %81 = vector.load %arg5[%c2_74, %c0_75, %c0_76] : memref<3x4x24xbf16, #tpu.memory_space<vmem>>, vector<1x4x24xbf16>
    %82 = vector.shape_cast %81 : vector<1x4x24xbf16> to vector<4x24xbf16>
    %cst_77 = arith.constant dense<0.000000e+00> : vector<4x256xf32>
    %83 = tpu.matmul %82, %80, %cst_77 {dimension_numbers = #tpu.dot_dimension_numbers<[1], [0], [0], [1], [0, 0, 1, 1], [], []>} : vector<4x24xbf16>, vector<24x256xbf16>, vector<4x256xf32> -> vector<4x256xf32>
    %84 = arith.addf %74, %83 : vector<4x256xf32>
    %c0_78 = arith.constant 0 : index
    %c0_79 = arith.constant 0 : index
    %85 = vector.load %arg6[%c0_78, %c0_79] : memref<4x1xf32, #tpu.memory_space<vmem>>, vector<4x1xf32>
    %86 = vector.broadcast %85 : vector<4x1xf32> to vector<4x256xf32>
    %87 = arith.addf %84, %86 : vector<4x256xf32>
    %88 = vector.broadcast %10 : f32 to vector<4x256xf32>
    %89 = arith.mulf %88, %13 : vector<4x256xf32>
    %90 = vector.broadcast %11 : f32 to vector<4x256xf32>
    %91 = arith.mulf %90, %87 : vector<4x256xf32>
    %92 = arith.addf %89, %91 : vector<4x256xf32>
    %c0_80 = arith.constant 0 : index
    %c0_81 = arith.constant 0 : index
    %c0_82 = arith.constant 0 : index
    %93 = vector.load %arg9[%c0_80, %c0_81, %c0_82] : memref<2x4x256xf32, #tpu.memory_space<vmem>>, vector<1x4x256xf32>
    %94 = vector.shape_cast %93 : vector<1x4x256xf32> to vector<4x256xf32>
    %95 = vector.shape_cast %92 : vector<4x256xf32> to vector<1x4x256xf32>
    tpu.vector_store %arg9[%c0_80, %c0_81, %c0_82], %95 {strides = array<i32>} : memref<2x4x256xf32, #tpu.memory_space<vmem>>, vector<1x4x256xf32>,
    %c1_83 = arith.constant 1 : index
    %c0_84 = arith.constant 0 : index
    %c0_85 = arith.constant 0 : index
    %96 = vector.load %arg1[%c1_83, %c0_84, %c0_85] : memref<2x4x256xf32, #tpu.memory_space<vmem>>, vector<1x4x256xf32>
    %97 = vector.shape_cast %96 : vector<1x4x256xf32> to vector<4x256xf32>
    %98 = arith.truncf %97 : vector<4x256xf32> to vector<4x256xbf16>
    %c0_86 = arith.constant 0 : index
    %c128_87 = arith.constant 128 : index
    %99 = vector.load %arg10[%c0_86, %c128_87] : memref<4x512xbf16, #tpu.memory_space<vmem>>, vector<4x256xbf16>
    tpu.vector_store %arg10[%c0_86, %c128_87], %98 {strides = array<i32>} : memref<4x512xbf16, #tpu.memory_space<vmem>>, vector<4x256xbf16>,
    %cst_88 = arith.constant 0.000000e+00 : f32
    %100 = vector.broadcast %cst_88 : f32 to vector<8x256xf32>
    %c0_89 = arith.constant 0 : index
    %c111_90 = arith.constant 111 : index
    %101 = vector.load %arg10[%c0_89, %c111_90] : memref<4x512xbf16, #tpu.memory_space<vmem>>, vector<4x256xbf16>
    %c0_91 = arith.constant 0 : index
    %c127_92 = arith.constant 127 : index
    %102 = vector.load %arg10[%c0_91, %c127_92] : memref<4x512xbf16, #tpu.memory_space<vmem>>, vector<4x256xbf16>
    %c0_93 = arith.constant 0 : index
    %c143_94 = arith.constant 143 : index
    %103 = vector.load %arg10[%c0_93, %c143_94] : memref<4x512xbf16, #tpu.memory_space<vmem>>, vector<4x256xbf16>
    %104 = tpu.concatenate %101, %102, %103 in 0 : vector<4x256xbf16>, vector<4x256xbf16>, vector<4x256xbf16> -> vector<12x256xbf16>
    %105 = vector.broadcast %8 : vector<1x256xbf16> to vector<12x256xbf16>
    %106 = arith.mulf %104, %105 : vector<12x256xbf16>
    %c0_95 = arith.constant 0 : index
    %c0_96 = arith.constant 0 : index
    %c0_97 = arith.constant 0 : index
    %107 = vector.load %arg2[%c0_95, %c0_96, %c0_97] : memref<3x8x12xbf16, #tpu.memory_space<vmem>>, vector<1x8x12xbf16>
    %108 = vector.shape_cast %107 : vector<1x8x12xbf16> to vector<8x12xbf16>
    %cst_98 = arith.constant dense<0.000000e+00> : vector<8x256xf32>
    %109 = tpu.matmul %108, %106, %cst_98 {dimension_numbers = #tpu.dot_dimension_numbers<[1], [0], [0], [1], [0, 0, 1, 1], [], []>} : vector<8x12xbf16>, vector<12x256xbf16>, vector<8x256xf32> -> vector<8x256xf32>
    %110 = arith.addf %100, %109 : vector<8x256xf32>
    %c0_99 = arith.constant 0 : index
    %c112_100 = arith.constant 112 : index
    %111 = vector.load %arg10[%c0_99, %c112_100] : memref<4x512xbf16, #tpu.memory_space<vmem>>, vector<4x256xbf16>
    %c0_101 = arith.constant 0 : index
    %c128_102 = arith.constant 128 : index
    %112 = vector.load %arg10[%c0_101, %c128_102] : memref<4x512xbf16, #tpu.memory_space<vmem>>, vector<4x256xbf16>
    %c0_103 = arith.constant 0 : index
    %c144_104 = arith.constant 144 : index
    %113 = vector.load %arg10[%c0_103, %c144_104] : memref<4x512xbf16, #tpu.memory_space<vmem>>, vector<4x256xbf16>
    %114 = tpu.concatenate %111, %112, %113 in 0 : vector<4x256xbf16>, vector<4x256xbf16>, vector<4x256xbf16> -> vector<12x256xbf16>
    %c1_105 = arith.constant 1 : index
    %c0_106 = arith.constant 0 : index
    %c0_107 = arith.constant 0 : index
    %115 = vector.load %arg2[%c1_105, %c0_106, %c0_107] : memref<3x8x12xbf16, #tpu.memory_space<vmem>>, vector<1x8x12xbf16>
    %116 = vector.shape_cast %115 : vector<1x8x12xbf16> to vector<8x12xbf16>
    %cst_108 = arith.constant dense<0.000000e+00> : vector<8x256xf32>
    %117 = tpu.matmul %116, %114, %cst_108 {dimension_numbers = #tpu.dot_dimension_numbers<[1], [0], [0], [1], [0, 0, 1, 1], [], []>} : vector<8x12xbf16>, vector<12x256xbf16>, vector<8x256xf32> -> vector<8x256xf32>
    %118 = arith.addf %110, %117 : vector<8x256xf32>
    %c0_109 = arith.constant 0 : index
    %c113_110 = arith.constant 113 : index
    %119 = vector.load %arg10[%c0_109, %c113_110] : memref<4x512xbf16, #tpu.memory_space<vmem>>, vector<4x256xbf16>
    %c0_111 = arith.constant 0 : index
    %c129_112 = arith.constant 129 : index
    %120 = vector.load %arg10[%c0_111, %c129_112] : memref<4x512xbf16, #tpu.memory_space<vmem>>, vector<4x256xbf16>
    %c0_113 = arith.constant 0 : index
    %c145_114 = arith.constant 145 : index
    %121 = vector.load %arg10[%c0_113, %c145_114] : memref<4x512xbf16, #tpu.memory_space<vmem>>, vector<4x256xbf16>
    %122 = tpu.concatenate %119, %120, %121 in 0 : vector<4x256xbf16>, vector<4x256xbf16>, vector<4x256xbf16> -> vector<12x256xbf16>
    %123 = vector.broadcast %9 : vector<1x256xbf16> to vector<12x256xbf16>
    %124 = arith.mulf %122, %123 : vector<12x256xbf16>
    %c2_115 = arith.constant 2 : index
    %c0_116 = arith.constant 0 : index
    %c0_117 = arith.constant 0 : index
    %125 = vector.load %arg2[%c2_115, %c0_116, %c0_117] : memref<3x8x12xbf16, #tpu.memory_space<vmem>>, vector<1x8x12xbf16>
    %126 = vector.shape_cast %125 : vector<1x8x12xbf16> to vector<8x12xbf16>
    %cst_118 = arith.constant dense<0.000000e+00> : vector<8x256xf32>
    %127 = tpu.matmul %126, %124, %cst_118 {dimension_numbers = #tpu.dot_dimension_numbers<[1], [0], [0], [1], [0, 0, 1, 1], [], []>} : vector<8x12xbf16>, vector<12x256xbf16>, vector<8x256xf32> -> vector<8x256xf32>
    %128 = arith.addf %118, %127 : vector<8x256xf32>
    %c0_119 = arith.constant 0 : index
    %c0_120 = arith.constant 0 : index
    %129 = vector.load %arg3[%c0_119, %c0_120] : memref<8x1xf32, #tpu.memory_space<vmem>>, vector<8x1xf32>
    %130 = vector.broadcast %129 : vector<8x1xf32> to vector<8x256xf32>
    %131 = arith.addf %128, %130 : vector<8x256xf32>
    %cst_121 = arith.constant 0.000000e+00 : f32
    %132 = vector.broadcast %cst_121 : f32 to vector<8x256xf32>
    %133 = arith.cmpf oge, %131, %132 : vector<8x256xf32>
    %c0_122 = arith.constant 0 : index
    %c0_123 = arith.constant 0 : index
    %134 = vector.load %arg4[%c0_122, %c0_123] : memref<8x1xf32, #tpu.memory_space<vmem>>, vector<8x1xf32>
    %135 = vector.broadcast %134 : vector<8x1xf32> to vector<8x256xf32>
    %136 = arith.mulf %135, %131 : vector<8x256xf32>
    %137 = arith.select %133, %131, %136 : vector<8x256xi1>, vector<8x256xf32>
    %138 = arith.truncf %137 : vector<8x256xf32> to vector<8x256xbf16>
    %c0_124 = arith.constant 0 : index
    %c128_125 = arith.constant 128 : index
    %139 = vector.load %arg11[%c0_124, %c128_125] : memref<8x512xbf16, #tpu.memory_space<vmem>>, vector<8x256xbf16>
    tpu.vector_store %arg11[%c0_124, %c128_125], %138 {strides = array<i32>} : memref<8x512xbf16, #tpu.memory_space<vmem>>, vector<8x256xbf16>,
    %cst_126 = arith.constant 0.000000e+00 : f32
    %140 = vector.broadcast %cst_126 : f32 to vector<4x256xf32>
    %c0_127 = arith.constant 0 : index
    %c111_128 = arith.constant 111 : index
    %141 = vector.load %arg11[%c0_127, %c111_128] : memref<8x512xbf16, #tpu.memory_space<vmem>>, vector<8x256xbf16>
    %c0_129 = arith.constant 0 : index
    %c127_130 = arith.constant 127 : index
    %142 = vector.load %arg11[%c0_129, %c127_130] : memref<8x512xbf16, #tpu.memory_space<vmem>>, vector<8x256xbf16>
    %c0_131 = arith.constant 0 : index
    %c143_132 = arith.constant 143 : index
    %143 = vector.load %arg11[%c0_131, %c143_132] : memref<8x512xbf16, #tpu.memory_space<vmem>>, vector<8x256xbf16>
    %144 = tpu.concatenate %141, %142, %143 in 0 : vector<8x256xbf16>, vector<8x256xbf16>, vector<8x256xbf16> -> vector<24x256xbf16>
    %145 = vector.broadcast %8 : vector<1x256xbf16> to vector<24x256xbf16>
    %146 = arith.mulf %144, %145 : vector<24x256xbf16>
    %c0_133 = arith.constant 0 : index
    %c0_134 = arith.constant 0 : index
    %c0_135 = arith.constant 0 : index
    %147 = vector.load %arg5[%c0_133, %c0_134, %c0_135] : memref<3x4x24xbf16, #tpu.memory_space<vmem>>, vector<1x4x24xbf16>
    %148 = vector.shape_cast %147 : vector<1x4x24xbf16> to vector<4x24xbf16>
    %cst_136 = arith.constant dense<0.000000e+00> : vector<4x256xf32>
    %149 = tpu.matmul %148, %146, %cst_136 {dimension_numbers = #tpu.dot_dimension_numbers<[1], [0], [0], [1], [0, 0, 1, 1], [], []>} : vector<4x24xbf16>, vector<24x256xbf16>, vector<4x256xf32> -> vector<4x256xf32>
    %150 = arith.addf %140, %149 : vector<4x256xf32>
    %c0_137 = arith.constant 0 : index
    %c112_138 = arith.constant 112 : index
    %151 = vector.load %arg11[%c0_137, %c112_138] : memref<8x512xbf16, #tpu.memory_space<vmem>>, vector<8x256xbf16>
    %c0_139 = arith.constant 0 : index
    %c128_140 = arith.constant 128 : index
    %152 = vector.load %arg11[%c0_139, %c128_140] : memref<8x512xbf16, #tpu.memory_space<vmem>>, vector<8x256xbf16>
    %c0_141 = arith.constant 0 : index
    %c144_142 = arith.constant 144 : index
    %153 = vector.load %arg11[%c0_141, %c144_142] : memref<8x512xbf16, #tpu.memory_space<vmem>>, vector<8x256xbf16>
    %154 = tpu.concatenate %151, %152, %153 in 0 : vector<8x256xbf16>, vector<8x256xbf16>, vector<8x256xbf16> -> vector<24x256xbf16>
    %c1_143 = arith.constant 1 : index
    %c0_144 = arith.constant 0 : index
    %c0_145 = arith.constant 0 : index
    %155 = vector.load %arg5[%c1_143, %c0_144, %c0_145] : memref<3x4x24xbf16, #tpu.memory_space<vmem>>, vector<1x4x24xbf16>
    %156 = vector.shape_cast %155 : vector<1x4x24xbf16> to vector<4x24xbf16>
    %cst_146 = arith.constant dense<0.000000e+00> : vector<4x256xf32>
    %157 = tpu.matmul %156, %154, %cst_146 {dimension_numbers = #tpu.dot_dimension_numbers<[1], [0], [0], [1], [0, 0, 1, 1], [], []>} : vector<4x24xbf16>, vector<24x256xbf16>, vector<4x256xf32> -> vector<4x256xf32>
    %158 = arith.addf %150, %157 : vector<4x256xf32>
    %c0_147 = arith.constant 0 : index
    %c113_148 = arith.constant 113 : index
    %159 = vector.load %arg11[%c0_147, %c113_148] : memref<8x512xbf16, #tpu.memory_space<vmem>>, vector<8x256xbf16>
    %c0_149 = arith.constant 0 : index
    %c129_150 = arith.constant 129 : index
    %160 = vector.load %arg11[%c0_149, %c129_150] : memref<8x512xbf16, #tpu.memory_space<vmem>>, vector<8x256xbf16>
    %c0_151 = arith.constant 0 : index
    %c145_152 = arith.constant 145 : index
    %161 = vector.load %arg11[%c0_151, %c145_152] : memref<8x512xbf16, #tpu.memory_space<vmem>>, vector<8x256xbf16>
    %162 = tpu.concatenate %159, %160, %161 in 0 : vector<8x256xbf16>, vector<8x256xbf16>, vector<8x256xbf16> -> vector<24x256xbf16>
    %163 = vector.broadcast %9 : vector<1x256xbf16> to vector<24x256xbf16>
    %164 = arith.mulf %162, %163 : vector<24x256xbf16>
    %c2_153 = arith.constant 2 : index
    %c0_154 = arith.constant 0 : index
    %c0_155 = arith.constant 0 : index
    %165 = vector.load %arg5[%c2_153, %c0_154, %c0_155] : memref<3x4x24xbf16, #tpu.memory_space<vmem>>, vector<1x4x24xbf16>
    %166 = vector.shape_cast %165 : vector<1x4x24xbf16> to vector<4x24xbf16>
    %cst_156 = arith.constant dense<0.000000e+00> : vector<4x256xf32>
    %167 = tpu.matmul %166, %164, %cst_156 {dimension_numbers = #tpu.dot_dimension_numbers<[1], [0], [0], [1], [0, 0, 1, 1], [], []>} : vector<4x24xbf16>, vector<24x256xbf16>, vector<4x256xf32> -> vector<4x256xf32>
    %168 = arith.addf %158, %167 : vector<4x256xf32>
    %c0_157 = arith.constant 0 : index
    %c0_158 = arith.constant 0 : index
    %169 = vector.load %arg6[%c0_157, %c0_158] : memref<4x1xf32, #tpu.memory_space<vmem>>, vector<4x1xf32>
    %170 = vector.broadcast %169 : vector<4x1xf32> to vector<4x256xf32>
    %171 = arith.addf %168, %170 : vector<4x256xf32>
    %172 = vector.broadcast %10 : f32 to vector<4x256xf32>
    %173 = arith.mulf %172, %97 : vector<4x256xf32>
    %174 = vector.broadcast %11 : f32 to vector<4x256xf32>
    %175 = arith.mulf %174, %171 : vector<4x256xf32>
    %176 = arith.addf %173, %175 : vector<4x256xf32>
    %c1_159 = arith.constant 1 : index
    %c0_160 = arith.constant 0 : index
    %c0_161 = arith.constant 0 : index
    %177 = vector.load %arg9[%c1_159, %c0_160, %c0_161] : memref<2x4x256xf32, #tpu.memory_space<vmem>>, vector<1x4x256xf32>
    %178 = vector.shape_cast %177 : vector<1x4x256xf32> to vector<4x256xf32>
    %179 = vector.shape_cast %176 : vector<4x256xf32> to vector<1x4x256xf32>
    tpu.vector_store %arg9[%c1_159, %c0_160, %c0_161], %179 {strides = array<i32>} : memref<2x4x256xf32, #tpu.memory_space<vmem>>, vector<1x4x256xf32>,
    return
  }
  func.func @transform_0(%arg0: i32) -> (i32, i32, i32) {
    %c0_i32 = arith.constant 0 : i32
    %c0_i32_0 = arith.constant 0 : i32
    %c0_i32_1 = arith.constant 0 : i32
    return %arg0, %c0_i32, %c0_i32_0 : i32, i32, i32
  }
  func.func @transform_1(%arg0: i32) -> (i32, i32, i32) {
    %c0_i32 = arith.constant 0 : i32
    %c0_i32_0 = arith.constant 0 : i32
    %c0_i32_1 = arith.constant 0 : i32
    %c0_i32_2 = arith.constant 0 : i32
    return %c0_i32, %c0_i32_0, %c0_i32_1 : i32, i32, i32
  }
  func.func @transform_2(%arg0: i32) -> (i32, i32) {
    %c0_i32 = arith.constant 0 : i32
    %c0_i32_0 = arith.constant 0 : i32
    %c0_i32_1 = arith.constant 0 : i32
    return %c0_i32, %c0_i32_0 : i32, i32
  }
  func.func @transform_3(%arg0: i32) -> (i32, i32) {
    %c0_i32 = arith.constant 0 : i32
    %c0_i32_0 = arith.constant 0 : i32
    %c0_i32_1 = arith.constant 0 : i32
    return %c0_i32, %c0_i32_0 : i32, i32
  }
  func.func @transform_4(%arg0: i32) -> (i32, i32, i32) {
    %c0_i32 = arith.constant 0 : i32
    %c0_i32_0 = arith.constant 0 : i32
    %c0_i32_1 = arith.constant 0 : i32
    %c0_i32_2 = arith.constant 0 : i32
    return %c0_i32, %c0_i32_0, %c0_i32_1 : i32, i32, i32
  }
  func.func @transform_5(%arg0: i32) -> (i32, i32) {
    %c0_i32 = arith.constant 0 : i32
    %c0_i32_0 = arith.constant 0 : i32
    %c0_i32_1 = arith.constant 0 : i32
    return %c0_i32, %c0_i32_0 : i32, i32
  }
  func.func @transform_6(%arg0: i32) -> (i32, i32) {
    %c0_i32 = arith.constant 0 : i32
    %c0_i32_0 = arith.constant 0 : i32
    %c0_i32_1 = arith.constant 0 : i32
    return %c0_i32, %c0_i32_0 : i32, i32
  }
  func.func @transform_7(%arg0: i32) -> i32 {
    %c0_i32 = arith.constant 0 : i32
    %c0_i32_0 = arith.constant 0 : i32
    return %c0_i32 : i32
  }
  func.func @transform_8(%arg0: i32) -> (i32, i32, i32) {
    %c0_i32 = arith.constant 0 : i32
    %c0_i32_0 = arith.constant 0 : i32
    %c0_i32_1 = arith.constant 0 : i32
    return %arg0, %c0_i32, %c0_i32_0 : i32, i32, i32
  }
}

</mosaic_0001>

<bundles_post_ra>
// kernel: one_conv_forward.1
= control target key start
LH: loop header
LB: loop body
LE: loop exit
PB: predicated region body
PF: predicated region fallthrough
CT: control target
= control target key end

     0   :  { %13 = vsyncpa [#allocation5], 0  ;;  %s2362_s0 = inlined_call_operand.vmem [shape: f32[2,4,256], index: 0, kind: input, shape index: {}]   ;;  %s2363_s1 = inlined_call_operand.vmem [shape: bf16[3,8,12], index: 1, kind: input, shape index: {}]   ;;  %s2364_s2 = inlined_call_operand.vmem [shape: f32[8,1], index: 2, kind: input, shape index: {}]   ;;  %s2365_s3 = inlined_call_operand.vmem [shape: f32[8,1], index: 3, kind: input, shape index: {}]   ;;  %s2366_s4 = inlined_call_operand.vmem [shape: bf16[3,4,24], index: 4, kind: input, shape index: {}]   ;;  %s2367_s5 = inlined_call_operand.vmem [shape: f32[4,1], index: 5, kind: input, shape index: {}]   ;;  %s2368_s6 = inlined_call_operand.vmem [shape: bf16[2,256], index: 6, kind: input, shape index: {}]   ;;  %s2369_s7 = inlined_call_operand.vmem [shape: f32[2], index: 7, kind: input, shape index: {}]   ;;  %s2370_s8 = inlined_call_operand.vmem [shape: f32[2,4,256], index: 8, kind: output, shape index: {}]  }
   0x1   :  { %s34_s29 = sshll.u32 %s2369_s7, 4  ;;  %s35_s29 = int_to_ptr.vmem [resolvable:$true] %s34_s29 }
   0x2   :  { %s1775_s30 = scalar_lea.vmem %s35_s29, 16  ;;  %p1780_p1 = scmp.lt.s32.totalorder %s35_s29, %s35_s29 }
   0x3   :  { %p1776_p0 = scmp.ne.s32.totalorder %s35_s29, %s1775_s30  ;;  %p1781_p2 = scmp.lt.s32.totalorder %s1775_s30, %s1775_s30 }
   0x5   :  { %p1782_p3 = por %p1781_p2, %p1780_p1 }
   0x7   :  { %p1783_p4 = pnand %p1782_p3, %p1776_p0 }
   0x9   :  { %1786 = shalt.err (!%p1783_p4)
}
   0xa   :  { %s1789_s9 = smov [#allocation4]  }
   0xb   :  { %37 = dma.vmem_to_smem %s35_s29, 16, %s1789_s9, [#allocation5]  }
   0xc   :  { %1787 = dma.done.wait [#allocation5], 16  }
   0xd   :  { %1788 = vsyncadd [#allocation5], 4294967280 }
   0xe   :  { %41 = sfence }
   0xf   :  { %v1677_v0 = vld.sshfl [vmem:[%s2368_s6] sm:$0x11 pattern:$0x75316420]  ;;  %v75_v1 = vlaneseq  ;;  %v1790_v3 = vmov 1983009808  }
  0x10   :  { %v50_v2 = vld [vmem:[%s2362_s0] sm:$0xff]  ;;  %v73_v4 = vunpack.c.l.s4 %v1790_v3  ;;  %v1791_v6 = vmov 1966171168   ;;  %v1792_v9 = vmov 0   ;;  %v160_v11 = vcombine.high %v1677_v0, %v1677_v0  ;;  %s1793_s6 = smov 111   ;;  %s1794_s13 = smov 112  }
  0x11   :  { %v76_v5 = vshrl.u32 %v75_v1, 7  ;;  %v162_v7 = vunpack.c.l.s4 %v1791_v6  ;;  %v52_v8 = vcombine.high %v50_v2, %v50_v2  ;;  %44 = vst [vmem:[#allocation2 + $0x6] sm:$0x3] %v1792_v9  ;;  %43 = vst [vmem:[#allocation2] sm:$0x3] %v1792_v9  ;;  %1746 = vset.pattern.permute.xlu0 %v1792_v9  ;;  %1745 = vset.pattern.permute.xlu1 %v1792_v9  ;;  %s1795_s14 = smov 96  }
  0x12   :  { %45 = vst [vmem:[#allocation3] sm:$0xf] %v1792_v9  ;;  %46 = vst [vmem:[#allocation3 + $0xc] sm:$0xf] %v1792_v9  ;;  %286 = vmatprep.mubr.bf16.mxu0 %v1792_v9  ;;  %348 = vmatprep.mubr.bf16.mxu1 %v1792_v9  ;;  %v74_v13 = vunpack.c.0.s8 %v73_v4  ;;  %v1703_v34 = vld [vmem:[%s2362_s0 + $0x8] sm:$0xff]  ;;  %s1796_s17 = smov 113  }
  0x13   :  { %v163_v10 = vunpack.c.0.s8 %v162_v7  ;;  %v1675_v12 = vpack.c.bf16 %v52_v8, %v50_v2  ;;  %v180_v16 = vsub.s32 0, %v76_v5  ;;  %v906_v35 = vcombine.high %v1703_v34, %v1703_v34  ;;  %s1797_s18 = smov 16   ;;  %s1798_s19 = smov 17  }
  0x14   :  { %v1862_v18 = vsub.s32 %v74_v13, %v76_v5  ;;  %vm102_vm0 = vcmask 916480   ;;  %vm132_vm1 = vcmask 1041408   ;;  %vm129_vm2 = vcmask 785408   ;;  %s1799_s20 = smov 15   ;;  %s1674_s24 = sld [smem:[#allocation4 + $0x1]] }
  0x15   :  { %v166_v14 = vsub.s32 %v163_v10, %v76_v5  ;;  %1676 = vst.sshfl [vmem:[#allocation2 + $0x2] sm:$0x33 pattern:$0x76325410] %v1675_v12  ;;  %v1704_v40 = vpack.c.bf16 %v906_v35, %v1703_v34  ;;  %vm142_vm3 = vcmask 1043456   ;;  %vm457_vm4 = vcmask 924672  }
  0x16   :  { %vm195_vm5 = vcmask 908288   ;;  %vm240_vm6 = vcmask 130048   ;;  %vm247_vm7 = vcmask 1045504   ;;  %vm243_vm8 = vcmask 97280  }
  0x17   :  { %v167_v15 = vrot.slane %v1677_v0, %v166_v14  ;;  %v174_v17 = vrot.slane %v160_v11, %v166_v14  ;;  %vm304_vm9 = vcmask 138240   ;;  %vm476_vm10 = vcmask 121856  }
  0x18   :  { %vm658_vm13 = vcmask 195584  }
  0x19   :  { %v176_v19 = vpack.i.b16 %v167_v15, %v167_v15  ;;  %v183_v20 = vpack.i.b16 %v174_v17, %v174_v17  ;;  %v437_v49 = vshrl.u32 %v167_v15, 16  ;;  %v444_v50 = vshrl.u32 %v174_v17, 16 }
  0x1b   :  { %v181_v21 = vrot.slane %v176_v19, %v180_v16  ;;  %v188_v22 = vrot.slane %v183_v20, %v180_v16  ;;  %v438_v52 = vpack.i.b16 %v437_v49, %v437_v49  ;;  %v445_v53 = vpack.i.b16 %v444_v50, %v444_v50 }
  0x1c   :  { %v1748_v23 = vld [vmem:[#allocation2 + $0x2] ss:$0 sps:$4 sm:$0xff]  }
  0x1d   :  { %v69_v24 = vld [vmem:[#allocation2 + $0x2] sm:$0x3f]  ;;  %191 = vrot.lane.b32.xlu0 %v181_v21, %s1793_s6  ;;  %193 = vrot.lane.b32.xlu1 %v188_v22, %s1793_s6  ;;  %v213_v28 = vrot.slane %v1748_v23, %v1862_v18  ;;  %v443_v54 = vrot.slane %v438_v52, %v180_v16  ;;  %v450_v55 = vrot.slane %v445_v53, %v180_v16 }
  0x1e   :  { %v113_v25 = vrot.slane %v69_v24, %v1862_v18  ;;  %v68_v26 = vld [vmem:[#allocation2] sm:$0x3f]  ;;  %v106_v27 = vcombine.high %v69_v24, %v69_v24 }
  0x1f   :  { %v1867_v29 = vrot.slane %v68_v26, %v1862_v18  ;;  %v214_v30 = vcombine.high %v213_v28, %v213_v28  ;;  %v87_v32 = vcombine.low %v68_v26, %v68_v26  ;;  %v358_v33 = vld [vmem:[#allocation2 + $0x2] sm:$0x3f]  ;;  %v71_v60 = vcombine.high %v68_v26, %v68_v26 }
  0x20   :  { %v120_v31 = vrot.slane %v106_v27, %v1862_v18  ;;  %v121_v36 = vcombine.low %v113_v25, %v113_v25  ;;  %v377_v37 = vcombine.low %v358_v33, %v358_v33  ;;  %v1879_v41 = vld [vmem:[#allocation2] sm:$0x3f]  ;;  %v391_v45 = vrot.slane %v358_v33, %v1862_v18 }
  0x21   :  { %215 = vrot.lane.b32.xlu0 %v213_v28, %s1794_s13  ;;  %125 = vrot.lane.b32.xlu1 %v113_v25, %s1795_s14  ;;  %v94_v39 = vrot.slane %v87_v32, %v1862_v18  ;;  %1705 = vst.sshfl [vmem:[#allocation2 + $0x2] sm:$0x33 pattern:$0x76325410] %v1704_v40  ;;  %v401_v46 = vcombine.high %v358_v33, %v358_v33  ;;  %v1960_v52 = vld [vmem:[%s2364_s2] sm:$0xff] }
  0x22   :  { %v122_v38 = vcombine.low %v120_v31, %v120_v31  ;;  %v384_v43 = vrot.slane %v377_v37, %v1862_v18  ;;  %v409_v47 = vcombine.low %v391_v45, %v391_v45  ;;  %v85_v63 = vrot.slane %v71_v60, %v1862_v18 }
  0x23   :  { %v95_v42 = vcombine.high %v94_v39, %v94_v39  ;;  %v408_v48 = vrot.slane %v401_v46, %v1862_v18  ;;  %v86_v0 = vcombine.high %v1867_v29, %v1867_v29  ;;  %v367_v25 = vrot.slane %v1879_v41, %v1862_v18 }
  0x24   :  { %v392_v44 = vcombine.high %v384_v43, %v384_v43 }
  0x25   :  { %217 = vrot.lane.b32.xlu0 %v214_v30, %s1794_s13  ;;  %100 = vrot.lane.b32.xlu1 %v1867_v29, %s1794_s13  ;;  %v410_v51 = vcombine.low %v408_v48, %v408_v48 }
  0x28   :  { %v1755_v49 = vld [vmem:[#allocation2 + $0x2] ss:$0 sps:$4 sm:$0xff]  }
  0x29   :  { %127 = vrot.lane.b32.xlu0 %v122_v38, %s1795_s14  ;;  %123 = vrot.lane.b32.xlu1 %v121_v36, %s1795_s14  ;;  %v360_v36 = vcombine.high %v1879_v41, %v1879_v41  ;;  %v923_v53 = vld [vmem:[#allocation2 + $0x2] sm:$0x3f] }
  0x2a   :  { %v959_v60 = vcombine.high %v923_v53, %v923_v53 }
  0x2b   :  { %v374_v46 = vrot.slane %v360_v36, %v1862_v18 }
  0x2d   :  { %98 = vrot.lane.b32.xlu0 %v95_v42, %s1794_s13  ;;  %96 = vrot.lane.b32.xlu1 %v94_v39, %s1794_s13 }
  0x31   :  { %393 = vrot.lane.b32.xlu0 %v384_v43, %s1794_s13  ;;  %395 = vrot.lane.b32.xlu1 %v392_v44, %s1794_s13 }
  0x35   :  { %397 = vrot.lane.b32.xlu0 %v391_v45, %s1794_s13  ;;  %411 = vrot.lane.b32.xlu1 %v409_v47, %s1795_s14 }
  0x39   :  { %413 = vrot.lane.b32.xlu0 %v391_v45, %s1795_s14  ;;  %415 = vrot.lane.b32.xlu1 %v410_v51, %s1795_s14 }
  0x3d   :  { %453 = vrot.lane.b32.xlu0 %v443_v54, %s1796_s17  ;;  %455 = vrot.lane.b32.xlu1 %v450_v55, %s1796_s17 }
  0x8f   :  { %v1894_v56 = vpop.permute.xlu0 %191  ;;  %v1896_v57 = vpop.permute.xlu1 %193 }
  0x90   :  { %v1953_v48 = vsel %vm195_vm5, %v1894_v56, %v1896_v57 }
  0x93   :  { %v216_v58 = vpop.permute.xlu0 %215  ;;  %v126_v59 = vpop.permute.xlu1 %125 }
  0x94   :  { %v221_v3 = vsel %vm132_vm1, %v1867_v29, %v216_v58 }
  0x97   :  { %v218_v61 = vpop.permute.xlu0 %217  ;;  %v101_v62 = vpop.permute.xlu1 %100 }
  0x98   :  { %v219_v1 = vsel %vm102_vm0, %v216_v58, %v218_v61  ;;  %v141_v2 = vsel %vm132_vm1, %v85_v63, %v101_v62  ;;  %v225_v13 = vsel %vm132_vm1, %v85_v63, %v218_v61  ;;  %v1015_v58 = vrot.slane %v1755_v49, %v1862_v18  ;;  %v1975_v63 = vld [vmem:[%s2365_s3] sm:$0xff]  ;;  %s2344_s3 = sld [smem:[#allocation4]] }
  0x99   :  { %v223_v10 = vsel %vm132_vm1, %v86_v0, %v219_v1  ;;  %v973_v1 = vrot.slane %v959_v60, %v1862_v18 }
  0x9b   :  { %v128_v4 = vpop.permute.xlu0 %127  ;;  %v124_v5 = vpop.permute.xlu1 %123 }
  0x9c   :  { %v131_v6 = vsel %vm129_vm2, %v126_v59, %v128_v4  ;;  %v226_v7 = vsel %vm142_vm3, %v221_v3, %v124_v5  ;;  %v130_v8 = vsel %vm129_vm2, %v124_v5, %v126_v59  ;;  %v966_v59 = vrot.slane %v923_v53, %v1862_v18  ;;  %v1754_v3 = vld [vmem:[#allocation3 + $0xc] ss:$0 sps:$4 sm:$0xff]  }
  0x9d   :  { %v150_v11 = vsel %vm142_vm3, %v141_v2, %v131_v6  ;;  %234 = vrot.lane.b32.xlu0 %v226_v7, %s1797_s18  ;;  %v227_v12 = vsel %vm142_vm3, %v223_v10, %v130_v8  ;;  %v228_v17 = vsel %vm142_vm3, %v225_v13, %v131_v6  ;;  %v975_v4 = vcombine.low %v973_v1, %v973_v1 }
  0x9e   :  { %236 = vrot.lane.b32.xlu1 %v227_v12, %s1797_s18  ;;  %v202_v19 = vmul.bf16 %v1896_v57, %v150_v11  ;;  %v1016_v7 = vcombine.high %v1015_v58, %v1015_v58 }
  0x9f   :  { %v99_v14 = vpop.permute.xlu0 %98  ;;  %v97_v15 = vpop.permute.xlu1 %96 }
  0xa0   :  { %v103_v16 = vsel %vm102_vm0, %v97_v15, %v99_v14  ;;  %v104_v28 = vsel %vm102_vm0, %v99_v14, %v101_v62  ;;  %v1969_v62 = vld [vmem:[#allocation2] sm:$0x3f] }
  0xa1   :  { %v135_v20 = vsel %vm132_vm1, %v1867_v29, %v103_v16  ;;  %238 = vrot.lane.b32.xlu0 %v228_v17, %s1797_s18  ;;  %v375_v29 = vcombine.high %v367_v25, %v367_v25  ;;  %v138_v34 = vsel %vm132_vm1, %v86_v0, %v104_v28  ;;  %v974_v0 = vcombine.low %v966_v59, %v966_v59  ;;  %v1678_v16 = vld [vmem:[%s2363_s1 + $0x4] sm:$0xf] }
  0xa2   :  { %302 = vrot.lane.b32.xlu1 %v202_v19, %s1798_s19  ;;  %v144_v21 = vsel %vm142_vm3, %v135_v20, %v124_v5  ;;  %v147_v41 = vsel %vm142_vm3, %v138_v34, %v130_v8  ;;  %v941_v2 = vcombine.low %v1969_v62, %v1969_v62  ;;  %v1993_v8 = vrot.slane %v1969_v62, %v1862_v18 }
  0xa3   :  { %v394_v22 = vpop.permute.xlu0 %393  ;;  %v396_v23 = vpop.permute.xlu1 %395  ;;  %v200_v24 = vmul.bf16 %v1894_v56, %v144_v21  ;;  %v201_v51 = vmul.bf16 %v1953_v48, %v147_v41 }
  0xa4   :  { %v399_v32 = vsel %vm102_vm0, %v394_v22, %v396_v23  ;;  %v421_v35 = vsel %vm132_vm1, %v367_v25, %v394_v22  ;;  %v948_v5 = vrot.slane %v941_v2, %v1862_v18 }
  0xa5   :  { %v424_v37 = vsel %vm132_vm1, %v375_v29, %v399_v32 }
  0xa6   :  { %298 = vrot.lane.b32.xlu1 %v200_v24, %s1798_s19  ;;  %v949_v6 = vcombine.high %v948_v5, %v948_v5 }
  0xa7   :  { %v398_v26 = vpop.permute.xlu0 %397  ;;  %v412_v27 = vpop.permute.xlu1 %411 }
  0xa8   :  { %v429_v38 = vsel %vm142_vm3, %v421_v35, %v412_v27  ;;  %v400_v47 = vsel %vm102_vm0, %v396_v23, %v398_v26 }
  0xa9   :  { %v427_v54 = vsel %vm132_vm1, %v374_v46, %v400_v47 }
  0xab   :  { %v414_v30 = vpop.permute.xlu0 %413  ;;  %v416_v31 = vpop.permute.xlu1 %415 }
  0xac   :  { %v417_v33 = vsel %vm129_vm2, %v412_v27, %v414_v30  ;;  %v418_v50 = vsel %vm129_vm2, %v414_v30, %v416_v31  ;;  %v203_v27 = vld [vmem:[%s2363_s1] sm:$0xf]  ;;  %v1683_v31 = vld [vmem:[%s2363_s1 + $0x8] sm:$0xf] }
  0xad   :  { %v432_v43 = vsel %vm142_vm3, %v424_v37, %v417_v33  ;;  %v435_v55 = vsel %vm142_vm3, %v427_v54, %v418_v50 }
  0xaf   :  { %v1935_v39 = vpop.permute.xlu0 %453  ;;  %v1937_v40 = vpop.permute.xlu1 %455 }
  0xb0   :  { %v462_v42 = vmul.bf16 %v1935_v39, %v429_v38  ;;  %v1943_v44 = vsel %vm457_vm4, %v1935_v39, %v1937_v40  ;;  %v464_v61 = vmul.bf16 %v1937_v40, %v435_v55 }
  0xb1   :  { %v463_v45 = vmul.bf16 %v1943_v44, %v432_v43 }
  0xb2   :  { %470 = vrot.lane.b32.xlu0 %v462_v42, %s1799_s20 }
  0xb3   :  { %472 = vrot.lane.b32.xlu1 %v463_v45, %s1799_s20 }
  0xb6   :  { %300 = vrot.lane.b32.xlu0 %v201_v51, %s1798_s19 }
  0xb7   :  { %534 = vperm.xlu1 %1745, %v1960_v52  }
  0xba   :  { %474 = vrot.lane.b32.xlu0 %v464_v61, %s1799_s20 }
  0xbb   :  { %1017 = vrot.lane.b32.xlu1 %v1015_v58, %s1794_s13 }
  0xbe   :  { %544 = vperm.xlu0 %1746, %v1975_v63  }
  0xbf   :  { %976 = vrot.lane.b32.xlu1 %v974_v0, %s1795_s14 }
  0xc2   :  { %592 = vrot.lane.b32.xlu0 %v1754_v3, %s1795_s14 }
  0xc3   :  { %980 = vrot.lane.b32.xlu1 %v975_v4, %s1795_s14  ;;  %v1155_v4 = vld [vmem:[#allocation2 + $0x2] sm:$0x3f] }
  0xc6   :  { %787 = vrot.lane.b32.xlu0 %v1754_v3, %s1794_s13 }
  0xc7   :  { %952 = vrot.lane.b32.xlu1 %v949_v6, %s1794_s13 }
  0xca   :  { %1019 = vrot.lane.b32.xlu0 %v1016_v7, %s1794_s13 }
  0xce   :  { %978 = vrot.lane.b32.xlu0 %v966_v59, %s1795_s14 }
  0xd2   :  { %950 = vrot.lane.b32.xlu0 %v948_v5, %s1794_s13 }
  0xd6   :  { %954 = vrot.lane.b32.xlu0 %v1993_v8, %s1794_s13 }
 0x10f   :  { %v235_v10 = vpop.permute.xlu0 %234 }
 0x110   :  { %v237_v11 = vpop.permute.xlu1 %236 }
 0x111   :  { %v241_v12 = vsel %vm240_vm6, %v235_v10, %v237_v11  ;;  %v1174_v10 = vcombine.low %v1155_v4, %v1155_v4 }
 0x112   :  { %v249_v15 = vsel %vm247_vm7, %v241_v12, 0 }
 0x113   :  { %v239_v13 = vpop.permute.xlu0 %238  ;;  %v1181_v12 = vrot.slane %v1174_v10, %v1862_v18 }
 0x114   :  { %v242_v14 = vsel %vm240_vm6, %v237_v11, %v239_v13  ;;  %v303_v17 = vpop.permute.xlu1 %302 }
 0x115   :  { %1679 = vmatprep.subr.msk.bf16.mxu0 %vm247_vm7, %v242_v14 }
 0x116   :  { %269 = vmatpush1.bf16.msra.mxu0 %v249_v15  ;;  %v1189_v15 = vcombine.high %v1181_v12, %v1181_v12 }
 0x118   :  { %v299_v19 = vpop.permute.xlu1 %298 }
 0x119   :  { %1680 = vmatmul.mubr.msk.bf16.vlgmr.msra.gmra.mxu0 %vm243_vm8, %v1678_v16  ;;  %v1188_v16 = vrot.slane %v1155_v4, %v1862_v18 }
 0x11a   :  { %520 = vmatprep.mubr.bf16.mxu0 %v1792_v9 }
 0x124   :  { %v471_v20 = vpop.permute.xlu0 %470 }
 0x125   :  { %v473_v21 = vpop.permute.xlu1 %472 }
 0x126   :  { %v477_v26 = vsel %vm476_vm10, %v471_v20, %v473_v21 }
 0x127   :  { %v483_v30 = vsel %vm247_vm7, %v477_v26, 0 }
 0x128   :  { %v301_v22 = vpop.permute.xlu0 %300 }
 0x129   :  { %v306_v23 = vsel %vm304_vm9, %v301_v22, %v303_v17  ;;  %v305_v24 = vsel %vm304_vm9, %v299_v19, %v301_v22  ;;  %v1198_v17 = vcombine.high %v1155_v4, %v1155_v4  ;;  %v1206_v19 = vcombine.low %v1188_v16, %v1188_v16 }
 0x12a   :  { %1681 = vmatprep.subr.msk.bf16.mxu1 %vm247_vm7, %v306_v23  ;;  %v311_v25 = vsel %vm247_vm7, %v305_v24, 0  ;;  %v2051_v24 = vcombine.high %v1993_v8, %v1993_v8 }
 0x12b   :  { %331 = vmatpush1.bf16.msra.mxu1 %v311_v25  ;;  %v1205_v20 = vrot.slane %v1198_v17, %v1862_v18 }
 0x12c   :  { %v475_v28 = vpop.permute.xlu0 %474 }
 0x12d   :  { %v478_v29 = vsel %vm476_vm10, %v473_v21, %v475_v28  ;;  %v1207_v25 = vcombine.low %v1205_v20, %v1205_v20 }
 0x12e   :  { %1682 = vmatmul.mubr.msk.bf16.vlgmr.msra.gmra.mxu1 %vm243_vm8, %v203_v27  ;;  %1684 = vmatprep.subr.msk.bf16.mxu0 %vm247_vm7, %v478_v29 }
 0x12f   :  { %503 = vmatpush1.bf16.msra.mxu0 %v483_v30  ;;  %700 = vmatprep.mubr.bf16.mxu1 %v1792_v9  ;;  %v925_v30 = vcombine.high %v1969_v62, %v1969_v62 }
 0x132   :  { %1685 = vmatmul.mubr.msk.bf16.vlgmr.msra.gmra.mxu0 %vm243_vm8, %v1683_v31  ;;  %v535_v45 = vpop.permute.xlu1 %534 }
 0x133   :  { %774 = vmatprep.mubr.bf16.mxu0 %v1792_v9 }
 0x136   :  { %v1018_v21 = vpop.permute.xlu1 %1017 }
 0x139   :  { %v545_v53 = vpop.permute.xlu0 %544 }
 0x13a   :  { %v2057_v27 = vpop.permute.xlu1 %976 }
 0x13d   :  { %v593_v11 = vpop.permute.xlu0 %592 }
 0x141   :  { %v2037_v13 = vpop.permute.xlu0 %787 }
 0x145   :  { %v1020_v22 = vpop.permute.xlu0 %1019 }
 0x146   :  { %v1021_v23 = vsel %vm102_vm0, %v1018_v21, %v1020_v22 }
 0x147   :  { %v1025_v26 = vsel %vm132_vm1, %v2051_v24, %v1021_v23 }
 0x149   :  { %v979_v28 = vpop.permute.xlu0 %978 }
 0x14a   :  { %v2061_v29 = vsel %vm129_vm2, %v2057_v27, %v979_v28 }
 0x14b   :  { %v1029_v31 = vsel %vm142_vm3, %v1025_v26, %v2061_v29 }
 0x1d9   :  { %v288_v32 = vpop.f32.mrf.mxu0 }
 0x1db   :  { %v290_v33 = vpop.f32.mrf.mxu0 }
 0x1dd   :  { %v292_v34 = vpop.f32.mrf.mxu0 }
 0x1df   :  { %v293_v35 = vpop.f32.mrf.mxu0 }
 0x1e0   :  { %v981_v35 = vpop.permute.xlu1 %980 }
 0x1ee   :  { %v350_v36 = vpop.f32.mrf.mxu1 }
 0x1ef   :  { %v351_v38 = vadd.f32 %v350_v36, %v288_v32  ;;  %v1023_v32 = vsel %vm132_vm1, %v1993_v8, %v1018_v21  ;;  %v2081_v36 = vsel %vm129_vm2, %v979_v28, %v981_v35 }
 0x1f0   :  { %v352_v37 = vpop.f32.mrf.mxu1  ;;  %v1028_v34 = vsel %vm142_vm3, %v1023_v32, %v2057_v27 }
 0x1f1   :  { %v353_v41 = vadd.f32 %v352_v37, %v290_v33  ;;  %v2073_v33 = vrot.slane %v925_v30, %v1862_v18 }
 0x1f2   :  { %v354_v42 = vpop.f32.mrf.mxu1  ;;  %v522_v43 = vpop.f32.mrf.mxu0 }
 0x1f3   :  { %v529_v46 = vadd.f32 %v522_v43, %v351_v38  ;;  %v1027_v62 = vsel %vm132_vm1, %v2073_v33, %v1020_v22  ;;  %v953_v38 = vpop.permute.xlu1 %952  ;;  %v951_v42 = vpop.permute.xlu0 %950 }
 0x1f4   :  { %v355_v47 = vpop.f32.mrf.mxu1  ;;  %v524_v49 = vpop.f32.mrf.mxu0  ;;  %v1030_v37 = vsel %vm142_vm3, %v1027_v62, %v2081_v36 }
 0x1f5   :  { %v537_v50 = vadd.f32 %v535_v45, %v529_v46  ;;  %v530_v51 = vadd.f32 %v524_v49, %v353_v41 }
 0x1f6   :  { %v526_v54 = vpop.f32.mrf.mxu0 }
 0x1f7   :  { %v547_v55 = vmul.f32 %v545_v53, %v537_v50  ;;  %v538_v58 = vadd.f32 %v535_v45, %v530_v51  ;;  %vm539_vm11 = vcmp.ge.f32.partialorder %v537_v50, 0.0  ;;  %v2088_v45 = vpop.permute.xlu0 %954 }
 0x1f8   :  { %v527_v59 = vpop.f32.mrf.mxu0  ;;  %v957_v23 = vsel %vm102_vm0, %v953_v38, %v2088_v45 }
 0x1f9   :  { %vm540_vm12 = vcmp.ge.f32.partialorder %v538_v58, 0.0  ;;  %v548_v60 = vmul.f32 %v545_v53, %v538_v58  ;;  %v549_v61 = vsel %vm539_vm11, %v537_v50, %v547_v55  ;;  %v989_v62 = vsel %vm132_vm1, %v2051_v24, %v957_v23 }
 0x1fa   :  { %v1771_v2 = vpack.c.bf16 %v549_v61, %v549_v61  ;;  %v997_v24 = vsel %vm142_vm3, %v989_v62, %v2061_v29  ;;  %v992_v29 = vsel %vm132_vm1, %v2073_v33, %v2088_v45 }
 0x1fb   :  { %v550_v0 = vsel %vm540_vm12, %v538_v58, %v548_v60 }
 0x1fc   :  { %v1732_v1 = vpack.c.bf16 %v550_v0, %v549_v61  ;;  %588 = vrot.lane.b32.xlu1 %v1771_v2, %s1795_s14  ;;  %v1772_v3 = vpack.c.bf16 %v550_v0, %v550_v0 }
 0x1fe   :  { %559 = vst [vmem:[#allocation3 + $0x4] sm:$0xff] %v1732_v1 }
 0x200   :  { %590 = vrot.lane.b32.xlu1 %v1772_v3, %s1795_s14 }
 0x205   :  { %v2026_v5 = vld [vmem:[#allocation3 + $0x8] ss:$0 sps:$4 sm:$0xff]   ;;  %v560_v6 = vld [vmem:[#allocation3] sm:$0xff] }
 0x206   :  { %v2028_v7 = vcombine.high %v560_v6, %v560_v6  ;;  %576 = vrot.lane.b32.xlu0 %v2026_v5, %s1794_s13  ;;  %v2039_v14 = vcombine.low %v560_v6, %v560_v6 }
 0x208   :  { %574 = vrot.lane.b32.xlu1 %v2028_v7, %s1794_s13 }
 0x20a   :  { %626 = vrot.lane.b32.xlu0 %v1772_v3, %s1794_s13 }
 0x20c   :  { %624 = vrot.lane.b32.xlu1 %v1771_v2, %s1794_s13 }
 0x20e   :  { %783 = vrot.lane.b32.xlu0 %v1771_v2, %s1794_s13 }
 0x210   :  { %572 = vrot.lane.b32.xlu1 %v2039_v14, %s1794_s13 }
 0x212   :  { %1192 = vrot.lane.b32.xlu0 %v1189_v15, %s1794_s13 }
 0x214   :  { %785 = vrot.lane.b32.xlu1 %v1772_v3, %s1794_s13 }
 0x216   :  { %1208 = vrot.lane.b32.xlu0 %v1206_v19, %s1795_s14 }
 0x218   :  { %1190 = vrot.lane.b32.xlu1 %v1181_v12, %s1794_s13 }
 0x21a   :  { %1212 = vrot.lane.b32.xlu0 %v1207_v25, %s1795_s14  ;;  %v1154_v25 = vld [vmem:[#allocation2] sm:$0x3f] }
 0x21b   :  { %v1157_v35 = vcombine.high %v1154_v25, %v1154_v25 }
 0x21c   :  { %1194 = vrot.lane.b32.xlu1 %v1188_v16, %s1794_s13 }
 0x21e   :  { %1037 = vrot.lane.b32.xlu0 %v1029_v31, %s1797_s18 }
 0x220   :  { %1210 = vrot.lane.b32.xlu1 %v1188_v16, %s1795_s14 }
 0x224   :  { %1035 = vrot.lane.b32.xlu1 %v1028_v34, %s1797_s18 }
 0x228   :  { %1039 = vrot.lane.b32.xlu1 %v1030_v37, %s1797_s18  ;;  %v1164_v37 = vrot.slane %v1154_v25, %v1862_v18  ;;  %v1695_v25 = vld [vmem:[%s2366_s4 + $0x2] sm:$0x3] }
 0x26e   :  { %v589_v43 = vpop.permute.xlu1 %588 }
 0x26f   :  { %646 = vrot.lane.b32.xlu1 %v589_v43, %s1797_s18  ;;  %v614_v59 = vmul.bf16 %v589_v43, %v1894_v56  ;;  %v803_v1 = vmul.bf16 %v589_v43, %v1935_v39 }
 0x272   :  { %v591_v41 = vpop.permute.xlu1 %590 }
 0x273   :  { %v595_v46 = vsel %vm129_vm2, %v591_v41, %v593_v11  ;;  %v594_v47 = vsel %vm129_vm2, %v589_v43, %v591_v41 }
 0x274   :  { %650 = vrot.lane.b32.xlu1 %v595_v46, %s1797_s18  ;;  %648 = vrot.lane.b32.xlu0 %v594_v47, %s1797_s18  ;;  %v616_v0 = vmul.bf16 %v595_v46, %v1896_v57  ;;  %v804_v4 = vmul.bf16 %v594_v47, %v1943_v44  ;;  %v615_v10 = vmul.bf16 %v594_v47, %v1953_v48 }
 0x275   :  { %v805_v30 = vmul.bf16 %v595_v46, %v1937_v40 }
 0x278   :  { %v577_v49 = vpop.permute.xlu0 %576 }
 0x279   :  { %v609_v11 = vsel %vm142_vm3, %v2026_v5, %v577_v49 }
 0x27a   :  { %v575_v50 = vpop.permute.xlu1 %574  ;;  %v613_v17 = vmul.bf16 %v609_v11, %v1896_v57 }
 0x27b   :  { %v579_v12 = vsel %vm102_vm0, %v575_v50, %v577_v49 }
 0x27c   :  { %v627_v51 = vpop.permute.xlu0 %626  ;;  %v605_v19 = vsel %vm142_vm3, %v2028_v7, %v579_v12 }
 0x27d   :  { %v634_v53 = vsel %vm142_vm3, %v2026_v5, %v627_v51  ;;  %v612_v26 = vmul.bf16 %v605_v19, %v1953_v48 }
 0x27e   :  { %v625_v54 = vpop.permute.xlu1 %624  ;;  %644 = vrot.lane.b32.xlu0 %v634_v53, %s1797_s18  ;;  %v1172_v53 = vcombine.high %v1164_v37, %v1164_v37 }
 0x27f   :  { %v630_v55 = vsel %vm142_vm3, %v2039_v14, %v625_v54  ;;  %v628_v58 = vsel %vm102_vm0, %v625_v54, %v627_v51  ;;  %v1003_v51 = vmul.bf16 %v997_v24, %v1953_v48 }
 0x280   :  { %640 = vrot.lane.b32.xlu1 %v630_v55, %s1797_s18  ;;  %v632_v61 = vsel %vm142_vm3, %v2028_v7, %v628_v58  ;;  %v784_v2 = vpop.permute.xlu0 %783 }
 0x281   :  { %v792_v6 = vsel %vm142_vm3, %v2039_v14, %v784_v2 }
 0x282   :  { %v573_v60 = vpop.permute.xlu1 %572  ;;  %721 = vrot.lane.b32.xlu0 %v614_v59, %s1798_s19  ;;  %v800_v15 = vmul.bf16 %v792_v6, %v1935_v39 }
 0x283   :  { %v578_v20 = vsel %vm102_vm0, %v573_v60, %v575_v50 }
 0x284   :  { %642 = vrot.lane.b32.xlu1 %v632_v61, %s1797_s18  ;;  %v1193_v21 = vpop.permute.xlu0 %1192  ;;  %v601_v28 = vsel %vm142_vm3, %v2039_v14, %v578_v20 }
 0x285   :  { %v611_v43 = vmul.bf16 %v601_v28, %v1894_v56 }
 0x286   :  { %725 = vrot.lane.b32.xlu0 %v616_v0, %s1798_s19  ;;  %v786_v3 = vpop.permute.xlu1 %785 }
 0x287   :  { %v790_v22 = vsel %vm102_vm0, %v786_v3, %v2037_v13  ;;  %v789_v31 = vsel %vm102_vm0, %v784_v2, %v786_v3  ;;  %v956_v13 = vsel %vm102_vm0, %v951_v42, %v953_v38  ;;  %v1171_v42 = vrot.slane %v1157_v35, %v1862_v18 }
 0x288   :  { %820 = vrot.lane.b32.xlu1 %v803_v1, %s1799_s20  ;;  %v798_v32 = vsel %vm142_vm3, %v2026_v5, %v790_v22  ;;  %v1209_v14 = vpop.permute.xlu0 %1208  ;;  %v795_v41 = vsel %vm142_vm3, %v2028_v7, %v789_v31  ;;  %v986_v46 = vsel %vm132_vm1, %v1993_v8, %v956_v13 }
 0x289   :  { %v802_v5 = vmul.bf16 %v798_v32, %v1937_v40  ;;  %v801_v50 = vmul.bf16 %v795_v41, %v1943_v44  ;;  %v994_v8 = vsel %vm142_vm3, %v986_v46, %v2057_v27  ;;  %v1000_v27 = vsel %vm142_vm3, %v992_v29, %v2081_v36 }
 0x28a   :  { %822 = vrot.lane.b32.xlu0 %v804_v4, %s1799_s20  ;;  %v1191_v16 = vpop.permute.xlu1 %1190  ;;  %v1002_v59 = vmul.bf16 %v994_v8, %v1894_v56  ;;  %v1004_v0 = vmul.bf16 %v1000_v27, %v1896_v57 }
 0x28b   :  { %v1218_v38 = vsel %vm132_vm1, %v1164_v37, %v1191_v16  ;;  %v1196_v54 = vsel %vm102_vm0, %v1191_v16, %v1193_v21 }
 0x28c   :  { %723 = vrot.lane.b32.xlu1 %v615_v10, %s1798_s19  ;;  %v1213_v49 = vpop.permute.xlu0 %1212  ;;  %v1226_v18 = vsel %vm142_vm3, %v1218_v38, %v1209_v14  ;;  %v1221_v45 = vsel %vm132_vm1, %v1172_v53, %v1196_v54  ;;  %v1700_v53 = vld [vmem:[%s2366_s4 + $0x4] sm:$0x3] }
 0x28d   :  { %v1234_v33 = vmul.bf16 %v1226_v18, %v1935_v39 }
 0x28e   :  { %814 = vrot.lane.b32.xlu0 %v800_v15, %s1799_s20  ;;  %v1195_v34 = vpop.permute.xlu1 %1194 }
 0x28f   :  { %v1197_v47 = vsel %vm102_vm0, %v1193_v21, %v1195_v34 }
 0x290   :  { %719 = vrot.lane.b32.xlu1 %v613_v17, %s1798_s19  ;;  %v1224_v55 = vsel %vm132_vm1, %v1171_v42, %v1197_v47  ;;  %v1038_v10 = vpop.permute.xlu0 %1037 }
 0x292   :  { %717 = vrot.lane.b32.xlu0 %v612_v26, %s1798_s19  ;;  %v1211_v7 = vpop.permute.xlu1 %1210 }
 0x293   :  { %v1215_v58 = vsel %vm129_vm2, %v1211_v7, %v1213_v49  ;;  %v1214_v60 = vsel %vm129_vm2, %v1209_v14, %v1211_v7  ;;  %v617_v49 = vld [vmem:[%s2366_s4] sm:$0x3] }
 0x294   :  { %824 = vrot.lane.b32.xlu1 %v805_v30, %s1799_s20  ;;  %v1232_v61 = vsel %vm142_vm3, %v1224_v55, %v1215_v58  ;;  %v1229_v1 = vsel %vm142_vm3, %v1221_v45, %v1214_v60  ;;  %v1706_v55 = vld [vmem:[%s2363_s1 + $0x4] sm:$0xf]  ;;  %v1005_v45 = vld [vmem:[%s2363_s1] sm:$0xf] }
 0x295   :  { %v1236_v2 = vmul.bf16 %v1232_v61, %v1937_v40  ;;  %v1235_v36 = vmul.bf16 %v1229_v1, %v1943_v44 }
 0x296   :  { %715 = vrot.lane.b32.xlu0 %v611_v43, %s1798_s19  ;;  %v1036_v3 = vpop.permute.xlu1 %1035 }
 0x297   :  { %v1041_v42 = vsel %vm240_vm6, %v1036_v3, %v1038_v10  ;;  %v1765_v3 = vld [vmem:[#allocation3 + $0xc] ss:$0 sps:$4 sm:$0xff]  }
 0x298   :  { %818 = vrot.lane.b32.xlu1 %v802_v5, %s1799_s20 }
 0x29a   :  { %816 = vrot.lane.b32.xlu0 %v801_v50, %s1799_s20  ;;  %v1040_v4 = vpop.permute.xlu1 %1039  ;;  %v1047_v50 = vsel %vm247_vm7, %v1041_v42, 0 }
 0x29b   :  { %v1042_v47 = vsel %vm240_vm6, %v1038_v10, %v1040_v4 }
 0x29c   :  { %1098 = vrot.lane.b32.xlu1 %v1003_v51, %s1798_s19 }
 0x29e   :  { %1096 = vrot.lane.b32.xlu0 %v1002_v59, %s1798_s19 }
 0x2a0   :  { %1241 = vrot.lane.b32.xlu1 %v1234_v33, %s1799_s20 }
 0x2a2   :  { %1100 = vrot.lane.b32.xlu0 %v1004_v0, %s1798_s19 }
 0x2a4   :  { %1245 = vrot.lane.b32.xlu1 %v1236_v2, %s1799_s20 }
 0x2a6   :  { %1243 = vrot.lane.b32.xlu0 %v1235_v36, %s1799_s20  ;;  %v1711_v36 = vld [vmem:[%s2363_s1 + $0x8] sm:$0xf] }
 0x2a8   :  { %1314 = vperm.xlu1 %1745, %v1975_v63  }
 0x2aa   :  { %1304 = vperm.xlu0 %1746, %v1960_v52  }
 0x2ae   :  { %1362 = vrot.lane.b32.xlu0 %v1765_v3, %s1795_s14 }
 0x2e1   :  { %v647_v6 = vpop.permute.xlu1 %646 }
 0x2e6   :  { %v649_v11 = vpop.permute.xlu0 %648  ;;  %v651_v12 = vpop.permute.xlu1 %650 }
 0x2e7   :  { %v654_v15 = vsel %vm240_vm6, %v647_v6, %v649_v11  ;;  %v655_v16 = vsel %vm240_vm6, %v649_v11, %v651_v12 }
 0x2e8   :  { %v663_v17 = vsel %vm142_vm3, %v654_v15, 0  ;;  %1696 = vmatprep.subr.msk.bf16.mxu1 %vm142_vm3, %v655_v16 }
 0x2e9   :  { %681 = vmatpush1.bf16.msra.mxu1 %v663_v17 }
 0x2f0   :  { %v645_v19 = vpop.permute.xlu0 %644 }
 0x2f2   :  { %v641_v20 = vpop.permute.xlu1 %640 }
 0x2f4   :  { %v722_v63 = vpop.permute.xlu0 %721 }
 0x2f6   :  { %v643_v21 = vpop.permute.xlu1 %642 }
 0x2f7   :  { %v652_v52 = vsel %vm240_vm6, %v641_v20, %v643_v21  ;;  %v653_v22 = vsel %vm240_vm6, %v643_v21, %v645_v19 }
 0x2f8   :  { %682 = vmatprep.subr.bf16.mxu1 %v653_v22  ;;  %v726_v23 = vpop.permute.xlu0 %725 }
 0x2f9   :  { %683 = vmatpush1.bf16.msra.mxu1 %v652_v52 }
 0x2fa   :  { %v821_v26 = vpop.permute.xlu1 %820 }
 0x2fc   :  { %1697 = vmatmul.mubr.msk.bf16.vlgmr.msra.gmra.mxu1 %vm658_vm13, %v1695_v25  ;;  %v823_v28 = vpop.permute.xlu0 %822 }
 0x2fd   :  { %873 = vmatprep.mubr.bf16.mxu1 %v1792_v9  ;;  %v828_v35 = vsel %vm476_vm10, %v821_v26, %v823_v28 }
 0x2fe   :  { %v724_v30 = vpop.permute.xlu1 %723  ;;  %v836_v5 = vsel %vm142_vm3, %v828_v35, 0 }
 0x2ff   :  { %v729_v31 = vsel %vm304_vm9, %v722_v63, %v724_v30  ;;  %v730_v32 = vsel %vm304_vm9, %v724_v30, %v726_v23 }
 0x300   :  { %v737_v34 = vsel %vm142_vm3, %v729_v31, 0  ;;  %1698 = vmatprep.subr.msk.bf16.mxu0 %vm142_vm3, %v730_v32  ;;  %v815_v13 = vpop.permute.xlu0 %814 }
 0x301   :  { %755 = vmatpush1.bf16.msra.mxu0 %v737_v34 }
 0x302   :  { %v720_v62 = vpop.permute.xlu1 %719 }
 0x304   :  { %v718_v37 = vpop.permute.xlu0 %717 }
 0x305   :  { %v728_v14 = vsel %vm304_vm9, %v718_v37, %v720_v62 }
 0x306   :  { %v825_v43 = vpop.permute.xlu1 %824  ;;  %756 = vmatprep.subr.bf16.mxu0 %v728_v14 }
 0x307   :  { %v829_v41 = vsel %vm476_vm10, %v823_v28, %v825_v43 }
 0x308   :  { %1701 = vmatprep.subr.msk.bf16.mxu1 %vm142_vm3, %v829_v41  ;;  %v716_v46 = vpop.permute.xlu0 %715 }
 0x309   :  { %854 = vmatpush1.bf16.msra.mxu1 %v836_v5  ;;  %v727_v24 = vsel %vm304_vm9, %v716_v46, %v718_v37 }
 0x30a   :  { %v819_v38 = vpop.permute.xlu1 %818  ;;  %757 = vmatpush1.bf16.msra.mxu0 %v727_v24 }
 0x30b   :  { %1707 = vmatprep.subr.msk.bf16.mxu0 %vm247_vm7, %v1042_v47 }
 0x30c   :  { %v817_v7 = vpop.permute.xlu0 %816 }
 0x30d   :  { %v826_v51 = vsel %vm476_vm10, %v815_v13, %v817_v7  ;;  %1699 = vmatmul.mubr.msk.bf16.vlgmr.msra.gmra.mxu0 %vm658_vm13, %v617_v49  ;;  %v827_v8 = vsel %vm476_vm10, %v817_v7, %v819_v38 }
 0x30e   :  { %v1099_v29 = vpop.permute.xlu1 %1098  ;;  %855 = vmatprep.subr.bf16.mxu1 %v827_v8  ;;  %1067 = vmatpush1.bf16.msra.mxu0 %v1047_v50 }
 0x30f   :  { %856 = vmatpush1.bf16.msra.mxu1 %v826_v51  ;;  %1084 = vmatprep.mubr.bf16.mxu0 %v1792_v9 }
 0x310   :  { %v1097_v18 = vpop.permute.xlu0 %1096 }
 0x311   :  { %v1102_v58 = vsel %vm304_vm9, %v1097_v18, %v1099_v29 }
 0x312   :  { %1702 = vmatmul.mubr.msk.bf16.vlgmr.msra.gmra.mxu1 %vm658_vm13, %v1700_v53  ;;  %v1242_v54 = vpop.permute.xlu1 %1241  ;;  %v1108_v33 = vsel %vm247_vm7, %v1102_v58, 0 }
 0x313   :  { %1145 = vmatprep.mubr.bf16.mxu1 %v1792_v9 }
 0x314   :  { %v1101_v59 = vpop.permute.xlu0 %1100 }
 0x315   :  { %v1103_v27 = vsel %vm304_vm9, %v1099_v29, %v1101_v59  ;;  %1708 = vmatmul.mubr.msk.bf16.vlgmr.msra.gmra.mxu0 %vm243_vm8, %v1706_v55 }
 0x316   :  { %1709 = vmatprep.subr.msk.bf16.mxu1 %vm247_vm7, %v1103_v27  ;;  %1290 = vmatprep.mubr.bf16.mxu0 %v1792_v9  ;;  %v1246_v61 = vpop.permute.xlu1 %1245 }
 0x317   :  { %1128 = vmatpush1.bf16.msra.mxu1 %v1108_v33 }
 0x318   :  { %v1244_v60 = vpop.permute.xlu0 %1243 }
 0x319   :  { %v1247_v0 = vsel %vm476_vm10, %v1242_v54, %v1244_v60  ;;  %v1248_v1 = vsel %vm476_vm10, %v1244_v60, %v1246_v61 }
 0x31a   :  { %v1253_v2 = vsel %vm247_vm7, %v1247_v0, 0  ;;  %1710 = vmatmul.mubr.msk.bf16.vlgmr.msra.gmra.mxu1 %vm243_vm8, %v1005_v45  ;;  %1712 = vmatprep.subr.msk.bf16.mxu0 %vm247_vm7, %v1248_v1 }
 0x31b   :  { %1273 = vmatpush1.bf16.msra.mxu0 %v1253_v2  ;;  %1468 = vmatprep.mubr.bf16.mxu1 %v1792_v9 }
 0x31e   :  { %1713 = vmatmul.mubr.msk.bf16.vlgmr.msra.gmra.mxu0 %vm243_vm8, %v1711_v36 }
 0x31f   :  { %1542 = vmatprep.mubr.bf16.mxu0 %v1792_v9 }
 0x323   :  { %v1315_v38 = vpop.permute.xlu1 %1314 }
 0x325   :  { %v1305_v37 = vpop.permute.xlu0 %1304 }
 0x329   :  { %v1363_v27 = vpop.permute.xlu0 %1362 }
 0x3bc   :  { %v702_v4 = vpop.f32.mrf.mxu1 }
 0x3be   :  { %v704_v6 = vpop.f32.mrf.mxu1 }
 0x3c0   :  { %v706_v10 = vpop.f32.mrf.mxu1 }
 0x3c2   :  { %v707_v11 = vpop.f32.mrf.mxu1 }
 0x3cd   :  { %v776_v12 = vpop.f32.mrf.mxu0 }
 0x3ce   :  { %v777_v15 = vadd.f32 %v776_v12, %v702_v4 }
 0x3cf   :  { %v778_v16 = vpop.f32.mrf.mxu0 }
 0x3d0   :  { %v779_v17 = vadd.f32 %v778_v16, %v704_v6 }
 0x3d1   :  { %v780_v19 = vpop.f32.mrf.mxu0 }
 0x3d2   :  { %v875_v20 = vpop.f32.mrf.mxu1 }
 0x3d3   :  { %v2248_v63 = vadd.f32 %v875_v20, %v777_v15  ;;  %v781_v21 = vpop.f32.mrf.mxu0 }
 0x3d4   :  { %v877_v52 = vpop.f32.mrf.mxu1 }
 0x3d5   :  { %v2250_v22 = vadd.f32 %v877_v52, %v779_v17  ;;  %v1086_v23 = vpop.f32.mrf.mxu0 }
 0x3d6   :  { %v879_v25 = vpop.f32.mrf.mxu1 }
 0x3d7   :  { %v1088_v26 = vpop.f32.mrf.mxu0 }
 0x3d8   :  { %v880_v28 = vpop.f32.mrf.mxu1 }
 0x3d9   :  { %v1090_v30 = vpop.f32.mrf.mxu0 }
 0x3da   :  { %v1147_v31 = vpop.f32.mrf.mxu1 }
 0x3db   :  { %v1091_v32 = vpop.f32.mrf.mxu0  ;;  %v1148_v13 = vadd.f32 %v1147_v31, %v1086_v23 }
 0x3dc   :  { %v1149_v34 = vpop.f32.mrf.mxu1 }
 0x3dd   :  { %v1150_v14 = vadd.f32 %v1149_v34, %v1088_v26 }
 0x3de   :  { %v1151_v62 = vpop.f32.mrf.mxu1  ;;  %v1292_v35 = vpop.f32.mrf.mxu0 }
 0x3df   :  { %v1299_v43 = vadd.f32 %v1292_v35, %v1148_v13 }
 0x3e0   :  { %v1152_v41 = vpop.f32.mrf.mxu1  ;;  %v1294_v5 = vpop.f32.mrf.mxu0 }
 0x3e1   :  { %v1307_v46 = vadd.f32 %v1305_v37, %v1299_v43  ;;  %v1300_v24 = vadd.f32 %v1294_v5, %v1150_v14 }
 0x3e2   :  { %v1296_v42 = vpop.f32.mrf.mxu0 }
 0x3e3   :  { %v1317_v47 = vmul.f32 %v1315_v38, %v1307_v46  ;;  %v1308_v49 = vadd.f32 %v1305_v37, %v1300_v24  ;;  %vm1309_vm14 = vcmp.ge.f32.partialorder %v1307_v46, 0.0 }
 0x3e4   :  { %v1297_v7 = vpop.f32.mrf.mxu0 }
 0x3e5   :  { %vm1310_vm15 = vcmp.ge.f32.partialorder %v1308_v49, 0.0  ;;  %v1318_v50 = vmul.f32 %v1315_v38, %v1308_v49  ;;  %v1319_v51 = vsel %vm1309_vm14, %v1307_v46, %v1317_v47 }
 0x3e6   :  { %v1774_v18 = vpack.c.bf16 %v1319_v51, %v1319_v51 }
 0x3e7   :  { %v1320_v8 = vsel %vm1310_vm15, %v1308_v49, %v1318_v50 }
 0x3e8   :  { %v1733_v29 = vpack.c.bf16 %v1320_v8, %v1319_v51  ;;  %v1773_v53 = vpack.c.bf16 %v1320_v8, %v1320_v8  ;;  %1358 = vrot.lane.b32.xlu0 %v1774_v18, %s1795_s14  ;;  %v1723_v8 = vld [vmem:[%s2366_s4 + $0x2] sm:$0x3] }
 0x3ea   :  { %1329 = vst [vmem:[#allocation3 + $0x4] sm:$0xff] %v1733_v29  ;;  %1360 = vrot.lane.b32.xlu1 %v1773_v53, %s1795_s14 }
 0x3ec   :  { %1396 = vrot.lane.b32.xlu0 %v1773_v53, %s1794_s13 }
 0x3ee   :  { %1394 = vrot.lane.b32.xlu1 %v1774_v18, %s1794_s13 }
 0x3f1   :  { %v1766_v54 = vld [vmem:[#allocation3 + $0x8] ss:$0 sps:$4 sm:$0xff]   ;;  %v1330_v55 = vld [vmem:[#allocation3] sm:$0xff] }
 0x3f2   :  { %v1716_v58 = vcombine.high %v1330_v55, %v1330_v55  ;;  %1346 = vrot.lane.b32.xlu0 %v1766_v54, %s1794_s13  ;;  %v1715_v59 = vcombine.low %v1330_v55, %v1330_v55 }
 0x3f4   :  { %1344 = vrot.lane.b32.xlu1 %v1716_v58, %s1794_s13 }
 0x3f6   :  { %1551 = vrot.lane.b32.xlu0 %v1774_v18, %s1794_s13 }
 0x3f8   :  { %1342 = vrot.lane.b32.xlu1 %v1715_v59, %s1794_s13 }
 0x3fa   :  { %1555 = vrot.lane.b32.xlu0 %v1765_v3, %s1794_s13 }
 0x3fc   :  { %1553 = vrot.lane.b32.xlu1 %v1773_v53, %s1794_s13 }
 0x45a   :  { %v1359_v45 = vpop.permute.xlu0 %1358 }
 0x45b   :  { %1415 = vrot.lane.b32.xlu1 %v1359_v45, %s1797_s18  ;;  %v1384_v11 = vmul.bf16 %v1359_v45, %v1894_v56  ;;  %v1571_v12 = vmul.bf16 %v1359_v45, %v1935_v39 }
 0x45c   :  { %v1361_v33 = vpop.permute.xlu1 %1360 }
 0x45d   :  { %v1364_v60 = vsel %vm129_vm2, %v1359_v45, %v1361_v33  ;;  %v1365_v1 = vsel %vm129_vm2, %v1361_v33, %v1363_v27 }
 0x45e   :  { %1417 = vrot.lane.b32.xlu0 %v1364_v60, %s1797_s18  ;;  %v1397_v0 = vpop.permute.xlu0 %1396  ;;  %v1386_v16 = vmul.bf16 %v1365_v1, %v1896_v57  ;;  %v1385_v17 = vmul.bf16 %v1364_v60, %v1953_v48  ;;  %v1572_v21 = vmul.bf16 %v1364_v60, %v1943_v44  ;;  %v1573_v23 = vmul.bf16 %v1365_v1, %v1937_v40 }
 0x45f   :  { %1419 = vrot.lane.b32.xlu1 %v1365_v1, %s1797_s18  ;;  %v1404_v3 = vsel %vm142_vm3, %v1766_v54, %v1397_v0 }
 0x460   :  { %v1395_v61 = vpop.permute.xlu1 %1394 }
 0x461   :  { %v1400_v2 = vsel %vm142_vm3, %v1715_v59, %v1395_v61  ;;  %v1398_v36 = vsel %vm102_vm0, %v1395_v61, %v1397_v0 }
 0x462   :  { %1409 = vrot.lane.b32.xlu0 %v1400_v2, %s1797_s18  ;;  %v1402_v6 = vsel %vm142_vm3, %v1716_v58, %v1398_v36 }
 0x463   :  { %1413 = vrot.lane.b32.xlu1 %v1404_v3, %s1797_s18  ;;  %v1387_v3 = vld [vmem:[%s2366_s4] sm:$0x3] }
 0x464   :  { %v1347_v10 = vpop.permute.xlu0 %1346 }
 0x465   :  { %v1379_v26 = vsel %vm142_vm3, %v1766_v54, %v1347_v10 }
 0x466   :  { %v1345_v4 = vpop.permute.xlu1 %1344  ;;  %1411 = vrot.lane.b32.xlu0 %v1402_v6, %s1797_s18  ;;  %v1383_v34 = vmul.bf16 %v1379_v26, %v1896_v57 }
 0x467   :  { %1489 = vrot.lane.b32.xlu1 %v1384_v11, %s1798_s19  ;;  %v1349_v20 = vsel %vm102_vm0, %v1345_v4, %v1347_v10 }
 0x468   :  { %v1552_v19 = vpop.permute.xlu0 %1551  ;;  %v1375_v25 = vsel %vm142_vm3, %v1716_v58, %v1349_v20 }
 0x469   :  { %v1382_v32 = vmul.bf16 %v1375_v25, %v1953_v48  ;;  %v1560_v48 = vsel %vm142_vm3, %v1715_v59, %v1552_v19 }
 0x46a   :  { %v1343_v15 = vpop.permute.xlu1 %1342  ;;  %1587 = vrot.lane.b32.xlu0 %v1571_v12, %s1799_s20  ;;  %v1568_v41 = vmul.bf16 %v1560_v48, %v1935_v39  ;;  %v1728_v12 = vld [vmem:[%s2366_s4 + $0x4] sm:$0x3] }
 0x46b   :  { %1493 = vrot.lane.b32.xlu1 %v1386_v16, %s1798_s19  ;;  %v1348_v28 = vsel %vm102_vm0, %v1343_v15, %v1345_v4  ;;  %v892_v15 = vstv %s2344_s3  ;;  %v894_v16 = vstv %s1674_s24 }
 0x46c   :  { %v1556_v30 = vpop.permute.xlu0 %1555  ;;  %v1371_v13 = vsel %vm142_vm3, %v1715_v59, %v1348_v28 }
 0x46d   :  { %v1381_v37 = vmul.bf16 %v1371_v13, %v1894_v56  ;;  %v884_v56 = vld [vmem:[%s2367_s5] sm:$0xf] }
 0x46e   :  { %1491 = vrot.lane.b32.xlu0 %v1385_v17, %s1798_s19  ;;  %v1554_v52 = vpop.permute.xlu1 %1553 }
 0x46f   :  { %1589 = vrot.lane.b32.xlu1 %v1572_v21, %s1799_s20  ;;  %v1557_v31 = vsel %vm102_vm0, %v1552_v19, %v1554_v52  ;;  %v1558_v62 = vsel %vm102_vm0, %v1554_v52, %v1556_v30  ;;  %v1769_v21 = vld [vmem:[%s2362_s0] sm:$0xff] }
 0x470   :  { %v1563_v35 = vsel %vm142_vm3, %v1716_v58, %v1557_v31  ;;  %v1566_v14 = vsel %vm142_vm3, %v1766_v54, %v1558_v62  ;;  %v893_v52 = vmul.f32 %v1769_v21, %v892_v15 }
 0x471   :  { %v1569_v43 = vmul.bf16 %v1563_v35, %v1943_v44  ;;  %v1570_v57 = vmul.bf16 %v1566_v14, %v1937_v40  ;;  %v1651_v44 = vld [vmem:[%s2367_s5] sm:$0xf] }
 0x472   :  { %1591 = vrot.lane.b32.xlu0 %v1573_v23, %s1799_s20 }
 0x473   :  { %1485 = vrot.lane.b32.xlu1 %v1382_v32, %s1798_s19 }
 0x476   :  { %1487 = vrot.lane.b32.xlu0 %v1383_v34, %s1798_s19 }
 0x477   :  { %1483 = vrot.lane.b32.xlu1 %v1381_v37, %s1798_s19 }
 0x47a   :  { %1583 = vrot.lane.b32.xlu0 %v1569_v43, %s1799_s20 }
 0x47b   :  { %1585 = vrot.lane.b32.xlu1 %v1570_v57, %s1799_s20 }
 0x47e   :  { %1581 = vrot.lane.b32.xlu0 %v1568_v41, %s1799_s20 }
 0x47f   :  { %887 = vperm.xlu1 %1745, %v884_v56  }
 0x482   :  { %1654 = vperm.xlu0 %1746, %v1651_v44  }
 0x4cd   :  { %v1416_v5 = vpop.permute.xlu1 %1415 }
 0x4d0   :  { %v1418_v46 = vpop.permute.xlu0 %1417 }
 0x4d1   :  { %v1423_v40 = vsel %vm240_vm6, %v1416_v5, %v1418_v46  ;;  %v1420_v24 = vpop.permute.xlu1 %1419 }
 0x4d2   :  { %v1424_v39 = vsel %vm240_vm6, %v1418_v46, %v1420_v24  ;;  %v1431_v42 = vsel %vm142_vm3, %v1423_v40, 0  ;;  %v1770_v24 = vld [vmem:[%s2362_s0 + $0x8] sm:$0xff] }
 0x4d3   :  { %1724 = vmatprep.subr.msk.bf16.mxu1 %vm142_vm3, %v1424_v39  ;;  %v1659_v39 = vmul.f32 %v1770_v24, %v892_v15 }
 0x4d4   :  { %v1410_v38 = vpop.permute.xlu0 %1409  ;;  %1449 = vmatpush1.bf16.msra.mxu1 %v1431_v42 }
 0x4d5   :  { %v1414_v47 = vpop.permute.xlu1 %1413 }
 0x4d8   :  { %v1412_v49 = vpop.permute.xlu0 %1411 }
 0x4d9   :  { %v1421_v7 = vsel %vm240_vm6, %v1410_v38, %v1412_v49  ;;  %v1422_v50 = vsel %vm240_vm6, %v1412_v49, %v1414_v47  ;;  %v1490_v51 = vpop.permute.xlu1 %1489 }
 0x4da   :  { %1450 = vmatprep.subr.bf16.mxu1 %v1422_v50 }
 0x4db   :  { %1451 = vmatpush1.bf16.msra.mxu1 %v1421_v7 }
 0x4dc   :  { %v1588_v29 = vpop.permute.xlu0 %1587 }
 0x4dd   :  { %v1494_v53 = vpop.permute.xlu1 %1493 }
 0x4de   :  { %1725 = vmatmul.mubr.msk.bf16.vlgmr.msra.gmra.mxu1 %vm658_vm13, %v1723_v8 }
 0x4df   :  { %1640 = vmatprep.mubr.bf16.mxu1 %v1792_v9 }
 0x4e0   :  { %v1492_v18 = vpop.permute.xlu0 %1491 }
 0x4e1   :  { %v1497_v54 = vsel %vm304_vm9, %v1490_v51, %v1492_v18  ;;  %v1498_v55 = vsel %vm304_vm9, %v1492_v18, %v1494_v53  ;;  %v1590_v59 = vpop.permute.xlu1 %1589 }
 0x4e2   :  { %v1505_v58 = vsel %vm142_vm3, %v1497_v54, 0  ;;  %1726 = vmatprep.subr.msk.bf16.mxu0 %vm142_vm3, %v1498_v55  ;;  %v1595_v27 = vsel %vm476_vm10, %v1588_v29, %v1590_v59 }
 0x4e3   :  { %1523 = vmatpush1.bf16.msra.mxu0 %v1505_v58  ;;  %v1603_v45 = vsel %vm142_vm3, %v1595_v27, 0 }
 0x4e4   :  { %v1592_v33 = vpop.permute.xlu0 %1591 }
 0x4e5   :  { %v1596_v60 = vsel %vm476_vm10, %v1590_v59, %v1592_v33  ;;  %v1486_v9 = vpop.permute.xlu1 %1485 }
 0x4e6   :  { %1729 = vmatprep.subr.msk.bf16.mxu1 %vm142_vm3, %v1596_v60 }
 0x4e7   :  { %1621 = vmatpush1.bf16.msra.mxu1 %v1603_v45 }
 0x4e8   :  { %v1488_v61 = vpop.permute.xlu0 %1487 }
 0x4e9   :  { %v1496_v0 = vsel %vm304_vm9, %v1486_v9, %v1488_v61  ;;  %v1484_v1 = vpop.permute.xlu1 %1483 }
 0x4ea   :  { %1524 = vmatprep.subr.bf16.mxu0 %v1496_v0  ;;  %v1495_v2 = vsel %vm304_vm9, %v1484_v1, %v1486_v9 }
 0x4eb   :  { %1525 = vmatpush1.bf16.msra.mxu0 %v1495_v2 }
 0x4ec   :  { %v1584_v36 = vpop.permute.xlu0 %1583 }
 0x4ed   :  { %v1586_v4 = vpop.permute.xlu1 %1585 }
 0x4ee   :  { %1727 = vmatmul.mubr.msk.bf16.vlgmr.msra.gmra.mxu0 %vm658_vm13, %v1387_v3  ;;  %v1594_v10 = vsel %vm476_vm10, %v1584_v36, %v1586_v4 }
 0x4ef   :  { %1622 = vmatprep.subr.bf16.mxu1 %v1594_v10 }
 0x4f0   :  { %v1582_v6 = vpop.permute.xlu0 %1581 }
 0x4f1   :  { %v1593_v11 = vsel %vm476_vm10, %v1582_v6, %v1584_v36 }
 0x4f2   :  { %1623 = vmatpush1.bf16.msra.mxu1 %v1593_v11 }
 0x4f5   :  { %1730 = vmatmul.mubr.msk.bf16.vlgmr.msra.gmra.mxu1 %vm658_vm13, %v1728_v12 }
 0x4fa   :  { %v888_v17 = vpop.permute.xlu1 %887 }
 0x4fb   :  { %v890_v19 = vadd.f32 %v888_v17, %v2248_v63  ;;  %v891_v20 = vadd.f32 %v888_v17, %v2250_v22 }
 0x4fd   :  { %v895_v23 = vmul.f32 %v894_v16, %v890_v19  ;;  %v896_v25 = vmul.f32 %v894_v16, %v891_v20  ;;  %v1655_v48 = vpop.permute.xlu0 %1654 }
 0x4ff   :  { %v899_v26 = vcombine.low %v895_v23, %v896_v25 }
 0x501   :  { %v901_v28 = vadd.f32 %v899_v26, %v893_v52 }
 0x503   :  { %902 = vst [vmem:[%s2370_s8] sm:$0xff] %v901_v28 }
 0x59e   :  { %v1470_v30 = vpop.f32.mrf.mxu1 }
 0x5a0   :  { %v1472_v31 = vpop.f32.mrf.mxu1 }
 0x5a2   :  { %v1474_v32 = vpop.f32.mrf.mxu1 }
 0x5a4   :  { %v1475_v34 = vpop.f32.mrf.mxu1 }
 0x5ae   :  { %v1544_v63 = vpop.f32.mrf.mxu0 }
 0x5af   :  { %v1545_v22 = vadd.f32 %v1544_v63, %v1470_v30 }
 0x5b0   :  { %v1546_v13 = vpop.f32.mrf.mxu0 }
 0x5b1   :  { %v1547_v37 = vadd.f32 %v1546_v13, %v1472_v31 }
 0x5b2   :  { %v1548_v62 = vpop.f32.mrf.mxu0 }
 0x5b4   :  { %v1549_v43 = vpop.f32.mrf.mxu0 }
 0x5b5   :  { %v1642_v35 = vpop.f32.mrf.mxu1 }
 0x5b6   :  { %v1649_v14 = vadd.f32 %v1642_v35, %v1545_v22 }
 0x5b7   :  { %v1644_v57 = vpop.f32.mrf.mxu1 }
 0x5b8   :  { %v1657_v41 = vadd.f32 %v1655_v48, %v1649_v14  ;;  %v1650_v56 = vadd.f32 %v1644_v57, %v1547_v37 }
 0x5b9   :  { %v1646_v44 = vpop.f32.mrf.mxu1 }
 0x5ba   :  { %v1658_v5 = vadd.f32 %v1655_v48, %v1650_v56  ;;  %v1660_v40 = vmul.f32 %v1657_v41, %v894_v16 }
 0x5bb   :  { %v1647_v46 = vpop.f32.mrf.mxu1 }
 0x5bc   :  { %v1661_v38 = vmul.f32 %v1658_v5, %v894_v16 }
 0x5be   :  { %v1664_v42 = vcombine.low %v1660_v40, %v1661_v38 }
 0x5c0   :  { %v1666_v47 = vadd.f32 %v1664_v42, %v1659_v39 }
 0x5c2   :  { %1731 = vst [vmem:[%s2370_s8 + $0x8] sm:$0xff] %v1666_v47 }
 0x5c3   :  { %1673 = vsyncpa [#allocation5], 1 }

</bundles_post_ra>
